<compile_context>
chip_gen: v7x
topology: tpu7x:2x2x1
jax: 0.10.0
libtpu: 0.0.40
codegen_flags: <defaults>
</compile_context>

<pallas_src>
import functools

import jax
import jax.numpy as jnp
from jax.experimental import pallas as pl
from jax.experimental.pallas import tpu as pltpu

_LANE = 128
_SUBLANE = 8


def _round_up(x, m):
    return ((x + m - 1) // m) * m


def _softplus(x):
    # numerically stable softplus == log(1 + exp(x)) == logaddexp(x, 0)
    return jnp.logaddexp(x, 0.0)


_NUM_TENSORCORES = None  # lazily detected


def _num_tensorcores():
    # Only v7x has 2 TensorCores per chip; splitting the batch grid axis is pure
    # per-step overhead on single-TC v5e/v6e.
    global _NUM_TENSORCORES
    if _NUM_TENSORCORES is None:
        try:
            kind = jax.devices()[0].device_kind.lower()
            _NUM_TENSORCORES = 2 if ("v7" in kind or "7x" in kind) else 1
        except Exception:
            _NUM_TENSORCORES = 1
    return _NUM_TENSORCORES


def _vmem_limit_bytes():
    # ~3/4 of physical VMEM (leaves headroom on v7x's 64 MiB), capped at 100 MiB on
    # the 128 MiB parts; v5e's scoped default is only 16 MiB, so raising it matters.
    try:
        cap = int(pltpu.get_tpu_info().vmem_capacity_bytes)
    except Exception:
        cap = 128 * 1024 * 1024
    return int(max(32 * 1024 * 1024, min(cap * 3 // 4, 100 * 1024 * 1024)))


# TODO(synk): only the activation='softplus', layer_norm=False configuration of
# BaseNet0 is implemented; relu/elu and the optional GroupNorm branch are omitted.
def basenet0_kernel(x_ref, w0_ref, b0_ref, w1_ref, b1_ref, w2_ref, b2_ref,
                    o_ref, *, n_layers):
    tile_m = x_ref.shape[0]
    x_dim = x_ref.shape[1]
    h_pad = w0_ref.shape[1]

    # ---- layer0: Linear(x_dim, h_pad) + Softplus (x_scale already folded into W0) ----
    if x_dim <= 8:
        # K = x_dim is tiny: a (tile_m, x_dim) @ (x_dim, h_pad) dot would run the MXU
        # at ~x_dim/256 K-utilisation and force a narrow-lane relayout of the x tile.
        # Do it as x_dim broadcast FMAs on the VPU instead (f32, exact).
        x = x_ref[...]
        z = jnp.broadcast_to(b0_ref[...], (tile_m, h_pad))
        for k in range(x_dim):
            z = z + x[:, k:k + 1] * w0_ref[k:k + 1, :]
    else:
        z = (jnp.dot(x_ref[...].astype(jnp.bfloat16),
                     w0_ref[...].astype(jnp.bfloat16),
                     preferred_element_type=jnp.float32)
             + b0_ref[...])
    h = _softplus(z).astype(jnp.bfloat16)

    # ---- layer1: n_layers x (Linear(h_pad, h_pad) + Softplus), bf16 MXU / f32 acc ----
    def layer(i, h):
        z = (jnp.dot(h, w1_ref[i], preferred_element_type=jnp.float32)
             + b1_ref[i][None, :])
        return _softplus(z).astype(jnp.bfloat16)

    if n_layers <= 4:
        for i in range(n_layers):            # shallow: static unroll (best LLO sched)
            h = layer(i, h)
    else:
        # deep: keep code size and vreg live ranges bounded
        h = jax.lax.fori_loop(0, n_layers, layer, h, unroll=2)

    # ---- layer2: Linear(h_pad, y_dim); gamma pre-applied to W2, bias zeroed at init --
    o_ref[...] = (jnp.dot(h, w2_ref[...], preferred_element_type=jnp.float32)
                  + b2_ref[...])


def prepare_basenet0_params(params, x_scale):
    """Fold x_scale into W0, pad the hidden width to a 128-lane multiple, cast the MXU
    weights (W1, W2) to bfloat16 and store biases 2-D.

    Padding contract (numerical exactness): padded hidden lanes carry softplus(0)=ln2
    junk, but every padded ROW of W1/W2 is exactly zero, so that junk never reaches a
    real lane; padded bias entries are zero.  Keep it that way if padding or the
    activation ever changes.
    """
    w0, b0, w1, b1, w2, b2 = params
    x_dim, h_dim = w0.shape
    n_layers = w1.shape[0]
    y_dim = w2.shape[1]
    h_pad = _round_up(h_dim, _LANE)

    # preprocess(x, scale) folded into W0: (x*s) @ W0 == x @ (s*W0)
    if isinstance(x_scale, (tuple, list)):
        if len(x_scale) != x_dim:
            raise ValueError('len(x_scale) != x_dim')
        scale = jnp.asarray(x_scale, jnp.float32).reshape(x_dim, 1)
    else:
        scale = jnp.float32(x_scale)
    w0 = w0 * scale

    f32, bf16 = jnp.float32, jnp.bfloat16
    w0p = jnp.zeros((x_dim, h_pad), f32).at[:, :h_dim].set(w0)
    b0p = jnp.zeros((1, h_pad), f32).at[:, :h_dim].set(b0.reshape(1, h_dim))
    w1p = jnp.zeros((n_layers, h_pad, h_pad), bf16).at[:, :h_dim, :h_dim].set(
        w1.astype(bf16))
    b1p = jnp.zeros((n_layers, h_pad), f32).at[:, :h_dim].set(
        b1.reshape(n_layers, h_dim))
    w2p = jnp.zeros((h_pad, y_dim), bf16).at[:h_dim, :].set(w2.astype(bf16))
    b2p = b2.reshape(1, y_dim).astype(f32)
    return (w0p, b0p, w1p, b1p, w2p, b2p)


def _default_tile_m(n, h_pad):
    # Big M tiles amortise the ~0.35us/step grid overhead; the cap shrinks with h_pad
    # so the live (tile_m, h_pad) activation + per-layer temporaries stay out of spill.
    if h_pad <= 256:
        cap = 1024
    elif h_pad <= 512:
        cap = 512
    else:
        cap = 256
    tm = min(_round_up(n, _SUBLANE), cap)
    if _num_tensorcores() >= 2 and n >= 2 * _SUBLANE:
        # v7x only: make sure the "parallel" batch axis has >= 2 grid steps so both
        # TensorCores get work.
        tm = min(tm, max(_SUBLANE, _round_up((n + 1) // 2, _SUBLANE)))
    return tm


# Module-level index maps (stable identities help pallas_call caching).
def _row_tile_map(i):
    return (i, 0)


def _const2_map(i):
    return (0, 0)


def _const3_map(i):
    return (0, 0, 0)


# TODO(synk): for large h_pad / n_layers the whole (n_layers, h_pad, h_pad) W1 stack is
# kept VMEM-resident; stream it one layer at a time from HBM (memory_space=pl.ANY +
# emit_pipeline / manual double-buffer) when n_layers*h_pad^2*2B approaches the VMEM
# budget (especially v7x's 64 MiB).  Not needed for the demo shapes here.
@functools.lru_cache(maxsize=None)
def _build_forward(n, x_dim, h_pad, y_dim, n_layers, tile_m):
    """Build (once per config) and return a jitted forward: (x, *params) -> (n, y_dim)."""
    n_pad = _round_up(n, tile_m)
    grid_m = n_pad // tile_m

    flops = 2 * n_pad * h_pad * (x_dim + n_layers * h_pad + y_dim)
    transcendentals = 2 * n_pad * h_pad * (n_layers + 1)       # exp + log per softplus
    bytes_accessed = (4 * n_pad * x_dim                        # x
                      + 4 * (x_dim + 1) * h_pad                # W0, b0 (f32)
                      + 2 * n_layers * h_pad * h_pad           # W1 stack (bf16)
                      + 4 * n_layers * h_pad                   # b1
                      + 2 * h_pad * y_dim + 4 * y_dim          # W2 (bf16), b2
                      + 4 * n_pad * y_dim)                     # out

    call = pl.pallas_call(
        functools.partial(basenet0_kernel, n_layers=n_layers),
        out_shape=jax.ShapeDtypeStruct((n_pad, y_dim), jnp.float32),
        grid_spec=pltpu.PrefetchScalarGridSpec(
            num_scalar_prefetch=0,
            grid=(grid_m,),
            in_specs=[
                pl.BlockSpec((tile_m, x_dim), _row_tile_map),           # x tile
                pl.BlockSpec((x_dim, h_pad), _const2_map),              # W0 (f32)
                pl.BlockSpec((1, h_pad), _const2_map),                  # b0
                pl.BlockSpec((n_layers, h_pad, h_pad), _const3_map),    # W1 stack (bf16)
                pl.BlockSpec((n_layers, h_pad), _const2_map),           # b1 stack
                pl.BlockSpec((h_pad, y_dim), _const2_map),              # W2 (bf16)
                pl.BlockSpec((1, y_dim), _const2_map),                  # b2
            ],
            # Unpadded (tile_m, y_dim) output block: the block's last dim equals the
            # full array dim so it lowers for any y_dim, and for tiny y_dim it writes
            # far less HBM than a 128-lane-padded output (and needs no wrapper slice).
            out_specs=pl.BlockSpec((tile_m, y_dim), _row_tile_map),
        ),
        compiler_params=pltpu.CompilerParams(
            dimension_semantics=("parallel",),
            vmem_limit_bytes=_vmem_limit_bytes()),
        cost_estimate=pl.CostEstimate(flops=flops,
                                      transcendentals=transcendentals,
                                      bytes_accessed=bytes_accessed),
    )

    def fwd(x, w0, b0, w1, b1, w2, b2):
        if n_pad != n:
            # Zero-pad the batch so boundary blocks never run softplus on undefined rows.
            x = jnp.pad(x, ((0, n_pad - n), (0, 0)))
        y = call(x, w0, b0, w1, b1, w2, b2)
        return y if n_pad == n else y[:n]

    return jax.jit(fwd)


def basenet0_forward(x, prepared_params, *, tile_m=None):
    """x: (n, x_dim) float32. prepared_params: output of prepare_basenet0_params."""
    w0, b0, w1, b1, w2, b2 = prepared_params
    n, x_dim = x.shape
    h_pad = w0.shape[1]
    y_dim = w2.shape[1]
    n_layers = w1.shape[0]
    if tile_m is None:
        tile_m = _default_tile_m(n, h_pad)
    fwd = _build_forward(n, x_dim, h_pad, y_dim, n_layers, int(tile_m))
    return fwd(x, w0, b0, w1, b1, w2, b2)


def init_basenet0_params(key, x_dim, h_dim, n_layers, y_dim, gamma):
    """Deterministic init mirroring PyTorch nn.Linear default (U(-k, k), k=1/sqrt(fan_in)).
    Weights are stored transposed: (in, out)."""
    ks = jax.random.split(key, 6)

    def uni(k, shape, fan_in):
        bound = 1.0 / jnp.sqrt(jnp.float32(fan_in))
        return jax.random.uniform(k, shape, jnp.float32, -bound, bound)

    w0 = uni(ks[0], (x_dim, h_dim), x_dim)
    b0 = uni(ks[1], (1, h_dim), x_dim)
    w1 = uni(ks[2], (n_layers, h_dim, h_dim), h_dim)
    b1 = uni(ks[3], (n_layers, 1, h_dim), h_dim)
    w2 = uni(ks[4], (h_dim, y_dim), h_dim) * jnp.float32(gamma)   # layer2.weight *= gamma
    b2 = jnp.zeros((1, y_dim), jnp.float32)                        # layer2.bias *= 0
    return (w0, b0, w1, b1, w2, b2)


def basenet0_reference(x, params, *, x_scale, n_layers):
    """Plain-JAX f32 reference of the PyTorch forward pass (for verification)."""
    w0, b0, w1, b1, w2, b2 = params
    if isinstance(x_scale, (tuple, list)):
        x = x * jnp.asarray(x_scale, jnp.float32).reshape(1, -1)
    else:
        x = x * x_scale
    h = jax.nn.softplus(x @ w0 + b0)
    for i in range(n_layers):
        h = jax.nn.softplus(h @ w1[i] + b1[i])
    return h @ w2 + b2


if __name__ == "__main__":
    # Small, forward-consistent shapes: batch=64 rows, x_dim=4, h_dim=32, y_dim=3.
    x_dim, h_dim, n_layers, y_dim = 4, 32, 2, 3
    x_scale = 1.5
    gamma = 0.1
    batch = 64

    key = jax.random.PRNGKey(0)
    k_params, k_x = jax.random.split(key)
    raw_params = init_basenet0_params(k_params, x_dim, h_dim, n_layers, y_dim, gamma)
    x = jax.random.normal(k_x, (batch, x_dim), jnp.float32)

    prepared_params = prepare_basenet0_params(raw_params, x_scale)

    y = basenet0_forward(x, prepared_params)
    y = jax.block_until_ready(y)
    # second call reuses the cached, already-compiled callable (no rebuild / retrace)
    y2 = jax.block_until_ready(basenet0_forward(x, prepared_params))

    y_ref = basenet0_reference(x, raw_params, x_scale=x_scale, n_layers=n_layers)
    assert y.shape == (batch, y_dim)
    # bf16 MXU matmuls with f32 accumulation: compare against the f32 reference at a
    # correspondingly loose tolerance.
    assert jnp.allclose(y, y_ref, atol=5e-2, rtol=5e-2), "mismatch vs. reference"
    assert jnp.allclose(y, y2), "cached-call mismatch"

    print("KERNEL_OK")
</pallas_src>

<mosaic_0001>
module attributes {stable_mosaic.version = 11 : i64} {
  func.func @basenet0_kernel(%arg0: i32, %arg1: memref<64x4xf32, #tpu.memory_space<vmem>>, %arg2: memref<4x128xf32, #tpu.memory_space<vmem>>, %arg3: memref<1x128xf32, #tpu.memory_space<vmem>>, %arg4: memref<2x128x128xbf16, #tpu.memory_space<vmem>>, %arg5: memref<2x128xf32, #tpu.memory_space<vmem>>, %arg6: memref<128x3xbf16, #tpu.memory_space<vmem>>, %arg7: memref<1x3xf32, #tpu.memory_space<vmem>>, %arg8: memref<64x3xf32, #tpu.memory_space<vmem>>) attributes {dimension_semantics = [#tpu.dimension_semantics<parallel>], iteration_bounds = array<i64: 1>, scalar_prefetch = 0 : i64, scratch_operands = 0 : i64, tpu.core_type = #tpu.core_type<tc>, window_params = [{transform_indices = @transform_0, window_bounds = array<i64: 64, 4>}, {pipeline_mode = #tpu.pipeline_mode<synchronous>, transform_indices = @transform_1, window_bounds = array<i64: 4, 128>}, {pipeline_mode = #tpu.pipeline_mode<synchronous>, transform_indices = @transform_2, window_bounds = array<i64: 1, 128>}, {pipeline_mode = #tpu.pipeline_mode<synchronous>, transform_indices = @transform_3, window_bounds = array<i64: 2, 128, 128>}, {pipeline_mode = #tpu.pipeline_mode<synchronous>, transform_indices = @transform_4, window_bounds = array<i64: 2, 128>}, {pipeline_mode = #tpu.pipeline_mode<synchronous>, transform_indices = @transform_5, window_bounds = array<i64: 128, 3>}, {pipeline_mode = #tpu.pipeline_mode<synchronous>, transform_indices = @transform_6, window_bounds = array<i64: 1, 3>}, {transform_indices = @transform_7, window_bounds = array<i64: 64, 3>}]} {
    %c0 = arith.constant 0 : index
    %c0_0 = arith.constant 0 : index
    %0 = vector.load %arg1[%c0, %c0_0] : memref<64x4xf32, #tpu.memory_space<vmem>>, vector<64x4xf32>
    %c0_1 = arith.constant 0 : index
    %c0_2 = arith.constant 0 : index
    %1 = vector.load %arg3[%c0_1, %c0_2] : memref<1x128xf32, #tpu.memory_space<vmem>>, vector<1x128xf32>
    %2 = vector.shape_cast %1 : vector<1x128xf32> to vector<1x128xf32>
    %3 = vector.broadcast %2 : vector<1x128xf32> to vector<64x128xf32>
    %4 = vector.extract_strided_slice %0 {offsets = [0, 0], sizes = [64, 1], strides = [1, 1]} : vector<64x4xf32> to vector<64x1xf32>
    %c0_3 = arith.constant 0 : index
    %c0_4 = arith.constant 0 : index
    %5 = vector.load %arg2[%c0_3, %c0_4] : memref<4x128xf32, #tpu.memory_space<vmem>>, vector<1x128xf32>
    %6 = vector.broadcast %4 : vector<64x1xf32> to vector<64x128xf32>
    %7 = vector.broadcast %5 : vector<1x128xf32> to vector<64x128xf32>
    %8 = arith.mulf %6, %7 : vector<64x128xf32>
    %9 = arith.addf %3, %8 : vector<64x128xf32>
    %10 = vector.extract_strided_slice %0 {offsets = [0, 1], sizes = [64, 1], strides = [1, 1]} : vector<64x4xf32> to vector<64x1xf32>
    %c1 = arith.constant 1 : index
    %c0_5 = arith.constant 0 : index
    %11 = vector.load %arg2[%c1, %c0_5] : memref<4x128xf32, #tpu.memory_space<vmem>>, vector<1x128xf32>
    %12 = vector.broadcast %10 : vector<64x1xf32> to vector<64x128xf32>
    %13 = vector.broadcast %11 : vector<1x128xf32> to vector<64x128xf32>
    %14 = arith.mulf %12, %13 : vector<64x128xf32>
    %15 = arith.addf %9, %14 : vector<64x128xf32>
    %16 = vector.extract_strided_slice %0 {offsets = [0, 2], sizes = [64, 1], strides = [1, 1]} : vector<64x4xf32> to vector<64x1xf32>
    %c2 = arith.constant 2 : index
    %c0_6 = arith.constant 0 : index
    %17 = vector.load %arg2[%c2, %c0_6] : memref<4x128xf32, #tpu.memory_space<vmem>>, vector<1x128xf32>
    %18 = vector.broadcast %16 : vector<64x1xf32> to vector<64x128xf32>
    %19 = vector.broadcast %17 : vector<1x128xf32> to vector<64x128xf32>
    %20 = arith.mulf %18, %19 : vector<64x128xf32>
    %21 = arith.addf %15, %20 : vector<64x128xf32>
    %22 = vector.extract_strided_slice %0 {offsets = [0, 3], sizes = [64, 1], strides = [1, 1]} : vector<64x4xf32> to vector<64x1xf32>
    %c3 = arith.constant 3 : index
    %c0_7 = arith.constant 0 : index
    %23 = vector.load %arg2[%c3, %c0_7] : memref<4x128xf32, #tpu.memory_space<vmem>>, vector<1x128xf32>
    %24 = vector.broadcast %22 : vector<64x1xf32> to vector<64x128xf32>
    %25 = vector.broadcast %23 : vector<1x128xf32> to vector<64x128xf32>
    %26 = arith.mulf %24, %25 : vector<64x128xf32>
    %27 = arith.addf %21, %26 : vector<64x128xf32>
    %cst = arith.constant 0.000000e+00 : f32
    %28 = vector.broadcast %cst : f32 to vector<64x128xf32>
    %29 = arith.maximumf %27, %28 : vector<64x128xf32>
    %30 = vector.broadcast %cst : f32 to vector<64x128xf32>
    %31 = arith.subf %27, %30 : vector<64x128xf32>
    %32 = arith.cmpf one, %31, %31 : vector<64x128xf32>
    %33 = vector.broadcast %cst : f32 to vector<64x128xf32>
    %34 = arith.addf %27, %33 : vector<64x128xf32>
    %35 = math.absf %31 : vector<64x128xf32>
    %cst_8 = arith.constant 0.000000e+00 : f32
    %36 = vector.broadcast %cst_8 : f32 to vector<64x128xf32>
    %37 = arith.subf %36, %35 : vector<64x128xf32>
    %38 = math.exp %37 : vector<64x128xf32>
    %39 = math.log1p %38 : vector<64x128xf32>
    %40 = arith.addf %29, %39 : vector<64x128xf32>
    %41 = arith.select %32, %34, %40 : vector<64x128xi1>, vector<64x128xf32>
    %42 = arith.truncf %41 : vector<64x128xf32> to vector<64x128xbf16>
    %c0_9 = arith.constant 0 : index
    %c0_10 = arith.constant 0 : index
    %c0_11 = arith.constant 0 : index
    %43 = vector.load %arg4[%c0_9, %c0_10, %c0_11] : memref<2x128x128xbf16, #tpu.memory_space<vmem>>, vector<1x128x128xbf16>
    %44 = vector.shape_cast %43 : vector<1x128x128xbf16> to vector<128x128xbf16>
    %cst_12 = arith.constant dense<0.000000e+00> : vector<64x128xf32>
    %45 = tpu.matmul %42, %44, %cst_12 {dimension_numbers = #tpu.dot_dimension_numbers<[1], [0], [0], [1], [0, 0, 1, 1], [], []>} : vector<64x128xbf16>, vector<128x128xbf16>, vector<64x128xf32> -> vector<64x128xf32>
    %c0_13 = arith.constant 0 : index
    %c0_14 = arith.constant 0 : index
    %46 = vector.load %arg5[%c0_13, %c0_14] : memref<2x128xf32, #tpu.memory_space<vmem>>, vector<1x128xf32>
    %47 = vector.shape_cast %46 : vector<1x128xf32> to vector<128xf32>
    %48 = vector.shape_cast %47 : vector<128xf32> to vector<1x128xf32>
    %49 = vector.broadcast %48 : vector<1x128xf32> to vector<64x128xf32>
    %50 = arith.addf %45, %49 : vector<64x128xf32>
    %cst_15 = arith.constant 0.000000e+00 : f32
    %51 = vector.broadcast %cst_15 : f32 to vector<64x128xf32>
    %52 = arith.maximumf %50, %51 : vector<64x128xf32>
    %53 = vector.broadcast %cst_15 : f32 to vector<64x128xf32>
    %54 = arith.subf %50, %53 : vector<64x128xf32>
    %55 = arith.cmpf one, %54, %54 : vector<64x128xf32>
    %56 = vector.broadcast %cst_15 : f32 to vector<64x128xf32>
    %57 = arith.addf %50, %56 : vector<64x128xf32>
    %58 = math.absf %54 : vector<64x128xf32>
    %cst_16 = arith.constant 0.000000e+00 : f32
    %59 = vector.broadcast %cst_16 : f32 to vector<64x128xf32>
    %60 = arith.subf %59, %58 : vector<64x128xf32>
    %61 = math.exp %60 : vector<64x128xf32>
    %62 = math.log1p %61 : vector<64x128xf32>
    %63 = arith.addf %52, %62 : vector<64x128xf32>
    %64 = arith.select %55, %57, %63 : vector<64x128xi1>, vector<64x128xf32>
    %65 = arith.truncf %64 : vector<64x128xf32> to vector<64x128xbf16>
    %c1_17 = arith.constant 1 : index
    %c0_18 = arith.constant 0 : index
    %c0_19 = arith.constant 0 : index
    %66 = vector.load %arg4[%c1_17, %c0_18, %c0_19] : memref<2x128x128xbf16, #tpu.memory_space<vmem>>, vector<1x128x128xbf16>
    %67 = vector.shape_cast %66 : vector<1x128x128xbf16> to vector<128x128xbf16>
    %cst_20 = arith.constant dense<0.000000e+00> : vector<64x128xf32>
    %68 = tpu.matmul %65, %67, %cst_20 {dimension_numbers = #tpu.dot_dimension_numbers<[1], [0], [0], [1], [0, 0, 1, 1], [], []>} : vector<64x128xbf16>, vector<128x128xbf16>, vector<64x128xf32> -> vector<64x128xf32>
    %c1_21 = arith.constant 1 : index
    %c0_22 = arith.constant 0 : index
    %69 = vector.load %arg5[%c1_21, %c0_22] : memref<2x128xf32, #tpu.memory_space<vmem>>, vector<1x128xf32>
    %70 = vector.shape_cast %69 : vector<1x128xf32> to vector<128xf32>
    %71 = vector.shape_cast %70 : vector<128xf32> to vector<1x128xf32>
    %72 = vector.broadcast %71 : vector<1x128xf32> to vector<64x128xf32>
    %73 = arith.addf %68, %72 : vector<64x128xf32>
    %cst_23 = arith.constant 0.000000e+00 : f32
    %74 = vector.broadcast %cst_23 : f32 to vector<64x128xf32>
    %75 = arith.maximumf %73, %74 : vector<64x128xf32>
    %76 = vector.broadcast %cst_23 : f32 to vector<64x128xf32>
    %77 = arith.subf %73, %76 : vector<64x128xf32>
    %78 = arith.cmpf one, %77, %77 : vector<64x128xf32>
    %79 = vector.broadcast %cst_23 : f32 to vector<64x128xf32>
    %80 = arith.addf %73, %79 : vector<64x128xf32>
    %81 = math.absf %77 : vector<64x128xf32>
    %cst_24 = arith.constant 0.000000e+00 : f32
    %82 = vector.broadcast %cst_24 : f32 to vector<64x128xf32>
    %83 = arith.subf %82, %81 : vector<64x128xf32>
    %84 = math.exp %83 : vector<64x128xf32>
    %85 = math.log1p %84 : vector<64x128xf32>
    %86 = arith.addf %75, %85 : vector<64x128xf32>
    %87 = arith.select %78, %80, %86 : vector<64x128xi1>, vector<64x128xf32>
    %88 = arith.truncf %87 : vector<64x128xf32> to vector<64x128xbf16>
    %c0_25 = arith.constant 0 : index
    %c0_26 = arith.constant 0 : index
    %89 = vector.load %arg6[%c0_25, %c0_26] : memref<128x3xbf16, #tpu.memory_space<vmem>>, vector<128x3xbf16>
    %cst_27 = arith.constant dense<0.000000e+00> : vector<64x3xf32>
    %90 = tpu.matmul %88, %89, %cst_27 {dimension_numbers = #tpu.dot_dimension_numbers<[1], [0], [0], [1], [0, 0, 1, 1], [], []>} : vector<64x128xbf16>, vector<128x3xbf16>, vector<64x3xf32> -> vector<64x3xf32>
    %c0_28 = arith.constant 0 : index
    %c0_29 = arith.constant 0 : index
    %91 = vector.load %arg7[%c0_28, %c0_29] : memref<1x3xf32, #tpu.memory_space<vmem>>, vector<1x3xf32>
    %92 = vector.broadcast %91 : vector<1x3xf32> to vector<64x3xf32>
    %93 = arith.addf %90, %92 : vector<64x3xf32>
    %c0_30 = arith.constant 0 : index
    %c0_31 = arith.constant 0 : index
    %94 = vector.load %arg8[%c0_30, %c0_31] : memref<64x3xf32, #tpu.memory_space<vmem>>, vector<64x3xf32>
    tpu.vector_store %arg8[%c0_30, %c0_31], %93 {strides = array<i32>} : memref<64x3xf32, #tpu.memory_space<vmem>>, vector<64x3xf32>,
    return
  }
  func.func @transform_0(%arg0: i32) -> (i32, i32) {
    %c0_i32 = arith.constant 0 : i32
    %c0_i32_0 = arith.constant 0 : i32
    return %arg0, %c0_i32 : i32, i32
  }
  func.func @transform_1(%arg0: i32) -> (i32, i32) {
    %c0_i32 = arith.constant 0 : i32
    %c0_i32_0 = arith.constant 0 : i32
    %c0_i32_1 = arith.constant 0 : i32
    return %c0_i32, %c0_i32_0 : i32, i32
  }
  func.func @transform_2(%arg0: i32) -> (i32, i32) {
    %c0_i32 = arith.constant 0 : i32
    %c0_i32_0 = arith.constant 0 : i32
    %c0_i32_1 = arith.constant 0 : i32
    return %c0_i32, %c0_i32_0 : i32, i32
  }
  func.func @transform_3(%arg0: i32) -> (i32, i32, i32) {
    %c0_i32 = arith.constant 0 : i32
    %c0_i32_0 = arith.constant 0 : i32
    %c0_i32_1 = arith.constant 0 : i32
    %c0_i32_2 = arith.constant 0 : i32
    return %c0_i32, %c0_i32_0, %c0_i32_1 : i32, i32, i32
  }
  func.func @transform_4(%arg0: i32) -> (i32, i32) {
    %c0_i32 = arith.constant 0 : i32
    %c0_i32_0 = arith.constant 0 : i32
    %c0_i32_1 = arith.constant 0 : i32
    return %c0_i32, %c0_i32_0 : i32, i32
  }
  func.func @transform_5(%arg0: i32) -> (i32, i32) {
    %c0_i32 = arith.constant 0 : i32
    %c0_i32_0 = arith.constant 0 : i32
    %c0_i32_1 = arith.constant 0 : i32
    return %c0_i32, %c0_i32_0 : i32, i32
  }
  func.func @transform_6(%arg0: i32) -> (i32, i32) {
    %c0_i32 = arith.constant 0 : i32
    %c0_i32_0 = arith.constant 0 : i32
    %c0_i32_1 = arith.constant 0 : i32
    return %c0_i32, %c0_i32_0 : i32, i32
  }
  func.func @transform_7(%arg0: i32) -> (i32, i32) {
    %c0_i32 = arith.constant 0 : i32
    %c0_i32_0 = arith.constant 0 : i32
    return %arg0, %c0_i32 : i32, i32
  }
}

</mosaic_0001>

<bundles_post_ra>
// kernel: fwd.1
= control target key start
LH: loop header
LB: loop body
LE: loop exit
PB: predicated region body
PF: predicated region fallthrough
CT: control target
= control target key end

     0   :  { %12 = vsyncpa [#allocation3], 0  ;;  %s2231_s0 = inlined_call_operand.hbm [shape: f32[64,4], index: 0, kind: input, shape index: {}]   ;;  %s2232_s1 = inlined_call_operand.hbm [shape: f32[4,128], index: 1, kind: input, shape index: {}]   ;;  %s2233_s2 = inlined_call_operand.hbm [shape: f32[1,128], index: 2, kind: input, shape index: {}]   ;;  %s2234_s3 = inlined_call_operand.hbm [shape: bf16[2,128,128], index: 3, kind: input, shape index: {}]   ;;  %s2235_s4 = inlined_call_operand.hbm [shape: f32[2,128], index: 4, kind: input, shape index: {}]   ;;  %s2236_s5 = inlined_call_operand.hbm [shape: bf16[128,3], index: 5, kind: input, shape index: {}]   ;;  %s2237_s6 = inlined_call_operand.hbm [shape: f32[1,3], index: 6, kind: input, shape index: {}]   ;;  %s2238_s7 = inlined_call_operand.hbm [shape: f32[64,3], index: 7, kind: output, shape index: {}]  }
   0x1   :  { %13 = vsyncpa [#allocation6], 0 }
   0x2   :  { %14 = vsyncpa [#allocation9], 0 }
   0x3   :  { %15 = vsyncpa [#allocation12], 0 }
   0x4   :  { %16 = vsyncpa [#allocation4], 0  ;;  %s1718_s24 = smov [#allocation5]   ;;  %s1719_s26 = smov [#allocation8]  }
   0x5   :  { %s35_s25 = sshll.u32 %s1718_s24, 4  ;;  %s54_s27 = sshll.u32 %s1719_s26, 4  ;;  %s36_s25 = int_to_ptr.vmem [resolvable:$true] %s35_s25  ;;  %s1774_s27 = int_to_ptr.vmem [resolvable:$true] %s54_s27 }
   0x6   :  { %s1532_s30 = scalar_lea.hbm %s2232_s1, 64 }
   0x7   :  { %p1533_p0 = scmp.ne.s32.totalorder %s2232_s1, %s1532_s30  ;;  %p1536_p1 = scmp.lt.u32.totalorder %s1532_s30, %s2232_s1 }
   0x9   :  { %p1538_p2 = pnand %p1536_p1, %p1533_p0 }
   0xb   :  { %1541 = shalt.err (!%p1538_p2)
}
   0xc   :  { %s1542_s12 = scalar_lea.vmem %s36_s25, 64  ;;  %p1547_p4 = scmp.lt.s32.totalorder %s36_s25, %s36_s25 }
   0xd   :  { %p1543_p3 = scmp.ne.s32.totalorder %s36_s25, %s1542_s12  ;;  %p1548_p5 = scmp.lt.s32.totalorder %s1542_s12, %s1542_s12 }
   0xf   :  { %p1549_p6 = por %p1548_p5, %p1547_p4 }
  0x11   :  { %p1550_p7 = pnand %p1549_p6, %p1543_p3 }
  0x13   :  { %1553 = shalt.err (!%p1550_p7)
}
  0x14   :  { %38 = dma.hbm_to_vmem [thread:$0]  %s2232_s1, 64, %s36_s25, [#allocation6]  }
  0x15   :  { %s1554_s17 = scalar_lea.hbm %s2234_s3, 2048 }
  0x16   :  { %p1555_p8 = scmp.ne.s32.totalorder %s2234_s3, %s1554_s17  ;;  %p1558_p9 = scmp.lt.u32.totalorder %s1554_s17, %s2234_s3 }
  0x18   :  { %p1560_p10 = pnand %p1558_p9, %p1555_p8 }
  0x1a   :  { %1563 = shalt.err (!%p1560_p10)
}
  0x1b   :  { %s1564_s22 = scalar_lea.vmem %s1774_s27, 2048  ;;  %p1569_p12 = scmp.lt.s32.totalorder %s1774_s27, %s1774_s27 }
  0x1c   :  { %p1565_p11 = scmp.ne.s32.totalorder %s1774_s27, %s1564_s22  ;;  %p1570_p13 = scmp.lt.s32.totalorder %s1564_s22, %s1564_s22 }
  0x1e   :  { %p1571_p0 = por %p1570_p13, %p1569_p12 }
  0x20   :  { %p1572_p1 = pnand %p1571_p0, %p1565_p11 }
  0x22   :  { %1575 = shalt.err (!%p1572_p1)
}
  0x23   :  { %s1720_s1 = smov 64   ;;  %s1721_s23 = smov 4  }
  0x24   :  { %60 = dma.hbm_to_vmem [thread:$0]  %s2234_s3, 2048, %s1774_s27, [#allocation9], %s1720_s1, %s1720_s1, %s1721_s23  }
  0x25   :  { %s1722_s26 = smov [#allocation11]   ;;  %s1723_s29 = smov [#allocation2]  }
  0x26   :  { %s76_s28 = sshll.u32 %s1722_s26, 4  ;;  %s22_s30 = sshll.u32 %s1723_s29, 4  ;;  %s77_s28 = int_to_ptr.vmem [resolvable:$true] %s76_s28  ;;  %s1805_s30 = int_to_ptr.vmem [resolvable:$true] %s22_s30 }
  0x27   :  { %s1576_s10 = scalar_lea.hbm %s2236_s5, 1024 }
  0x28   :  { %p1577_p2 = scmp.ne.s32.totalorder %s2236_s5, %s1576_s10  ;;  %p1580_p3 = scmp.lt.u32.totalorder %s1576_s10, %s2236_s5 }
  0x2a   :  { %p1582_p4 = pnand %p1580_p3, %p1577_p2 }
  0x2c   :  { %1585 = shalt.err (!%p1582_p4)
}
  0x2d   :  { %s1586_s3 = scalar_lea.vmem %s77_s28, 1024  ;;  %p1591_p6 = scmp.lt.s32.totalorder %s77_s28, %s77_s28 }
  0x2e   :  { %p1587_p5 = scmp.ne.s32.totalorder %s77_s28, %s1586_s3  ;;  %p1592_p7 = scmp.lt.s32.totalorder %s1586_s3, %s1586_s3 }
  0x30   :  { %p1593_p8 = por %p1592_p7, %p1591_p6 }
  0x32   :  { %p1594_p9 = pnand %p1593_p8, %p1587_p5 }
  0x34   :  { %1597 = shalt.err (!%p1594_p9)
}
  0x35   :  { %82 = dma.hbm_to_vmem [thread:$0]  %s2236_s5, 1024, %s77_s28, [#allocation12], %s1720_s1, %s1720_s1, %s1721_s23  }
  0x36   :  { %s1598_s18 = scalar_lea.hbm %s2231_s0, 1024 }
  0x37   :  { %p1599_p10 = scmp.ne.s32.totalorder %s2231_s0, %s1598_s18  ;;  %p1602_p11 = scmp.lt.u32.totalorder %s1598_s18, %s2231_s0 }
  0x39   :  { %p1604_p12 = pnand %p1602_p11, %p1599_p10 }
  0x3b   :  { %1607 = shalt.err (!%p1604_p12)
}
  0x3c   :  { %s1608_s24 = scalar_lea.vmem %s1805_s30, 1024  ;;  %p1613_p0 = scmp.lt.s32.totalorder %s1805_s30, %s1805_s30 }
  0x3d   :  { %p1609_p13 = scmp.ne.s32.totalorder %s1805_s30, %s1608_s24  ;;  %p1614_p1 = scmp.lt.s32.totalorder %s1608_s24, %s1608_s24 }
  0x3f   :  { %p1615_p2 = por %p1614_p1, %p1613_p0 }
  0x41   :  { %p1616_p3 = pnand %p1615_p2, %p1609_p13 }
  0x43   :  { %1619 = shalt.err (!%p1616_p3)
}
  0x44   :  { %s1724_s5 = smov 128   ;;  %s1725_s1 = smov 8  }
  0x45   :  { %28 = dma.hbm_to_vmem [thread:$0]  %s2231_s0, 1024, %s1805_s30, [#allocation3], %s1724_s5, %s1724_s5, %s1725_s1  }
  0x46   :  { %s1726_s26 = smov [#allocation7]   ;;  %s1727_s29 = smov [#allocation10]  }
  0x47   :  { %s45_s28 = sshll.u32 %s1726_s26, 4  ;;  %s67_s8 = sshll.u32 %s1727_s29, 4  ;;  %s46_s28 = int_to_ptr.vmem [resolvable:$true] %s45_s28  ;;  %s68_s8 = int_to_ptr.vmem [resolvable:$true] %s67_s8 }
  0x48   :  { %s1620_s11 = scalar_lea.hbm %s2233_s2, 16 }
  0x49   :  { %p1621_p4 = scmp.ne.s32.totalorder %s2233_s2, %s1620_s11  ;;  %p1624_p5 = scmp.lt.u32.totalorder %s1620_s11, %s2233_s2 }
  0x4b   :  { %p1626_p6 = pnand %p1624_p5, %p1621_p4 }
  0x4d   :  { %1629 = shalt.err (!%p1626_p6)
}
  0x4e   :  { %s1630_s0 = scalar_lea.vmem %s46_s28, 16  ;;  %s1634_s30 = scalar_lea.vmem %s46_s28, 32 }
  0x4f   :  { %p1631_p7 = scmp.ne.s32.totalorder %s46_s28, %s1630_s0  ;;  %p1635_p8 = scmp.lt.s32.totalorder %s46_s28, %s46_s28 }
  0x50   :  { %p1636_p9 = scmp.lt.s32.totalorder %s1634_s30, %s1630_s0 }
  0x52   :  { %p1637_p10 = por %p1636_p9, %p1635_p8 }
  0x54   :  { %p1638_p11 = pnand %p1637_p10, %p1631_p7 }
  0x56   :  { %1641 = shalt.err (!%p1638_p11)
}
  0x57   :  { %48 = dma.hbm_to_vmem [thread:$0]  %s2233_s2, 16, %s46_s28, [#allocation6]  }
  0x58   :  { %s1642_s18 = scalar_lea.hbm %s2235_s4, 32 }
  0x59   :  { %p1643_p12 = scmp.ne.s32.totalorder %s2235_s4, %s1642_s18  ;;  %p1646_p13 = scmp.lt.u32.totalorder %s1642_s18, %s2235_s4 }
  0x5b   :  { %p1648_p0 = pnand %p1646_p13, %p1643_p12 }
  0x5d   :  { %1651 = shalt.err (!%p1648_p0)
}
  0x5e   :  { %s1652_s24 = scalar_lea.vmem %s68_s8, 32  ;;  %p1657_p2 = scmp.lt.s32.totalorder %s68_s8, %s68_s8 }
  0x5f   :  { %p1653_p1 = scmp.ne.s32.totalorder %s68_s8, %s1652_s24  ;;  %p1658_p3 = scmp.lt.s32.totalorder %s1652_s24, %s1652_s24 }
  0x61   :  { %p1659_p4 = por %p1658_p3, %p1657_p2 }
  0x63   :  { %p1660_p5 = pnand %p1659_p4, %p1653_p1 }
  0x65   :  { %1663 = shalt.err (!%p1660_p5)
}
  0x66   :  { %70 = dma.hbm_to_vmem [thread:$0]  %s2235_s4, 32, %s68_s8, [#allocation9]  }
  0x67   :  { %s1728_s25 = smov [#allocation13]   ;;  %s1664_s9 = scalar_lea.hbm %s2237_s6, 16 }
  0x68   :  { %s89_s26 = sshll.u32 %s1728_s25, 4  ;;  %p1665_p6 = scmp.ne.s32.totalorder %s2237_s6, %s1664_s9  ;;  %s90_s26 = int_to_ptr.vmem [resolvable:$true] %s89_s26 }
  0x69   :  { %p1668_p7 = scmp.lt.u32.totalorder %s1664_s9, %s2237_s6 }
  0x6b   :  { %p1670_p8 = pnand %p1668_p7, %p1665_p6 }
  0x6d   :  { %1673 = shalt.err (!%p1670_p8)
}
  0x6e   :  { %s1674_s14 = scalar_lea.vmem %s90_s26, 16  ;;  %s1678_s4 = scalar_lea.vmem %s90_s26, 32 }
  0x6f   :  { %p1675_p9 = scmp.ne.s32.totalorder %s90_s26, %s1674_s14  ;;  %p1679_p10 = scmp.lt.s32.totalorder %s90_s26, %s90_s26 }
  0x70   :  { %p1680_p11 = scmp.lt.s32.totalorder %s1678_s4, %s1674_s14 }
  0x72   :  { %p1681_p12 = por %p1680_p11, %p1679_p10 }
  0x74   :  { %p1682_p13 = pnand %p1681_p12, %p1675_p9 }
  0x76   :  { %1685 = shalt.err (!%p1682_p13)
}
  0x77   :  { %92 = dma.hbm_to_vmem [thread:$0]  %s2237_s6, 16, %s90_s26, [#allocation12]  }
  0x78   :  { %1708 = dma.done.wait [#allocation3], 1024  }
  0x79   :  { %1709 = vsyncadd [#allocation3], 4294966272 }
  0x7a   :  { %1710 = dma.done.wait [#allocation6], 80  }
  0x7b   :  { %1711 = vsyncadd [#allocation6], 4294967216 }
  0x7c   :  { %1712 = dma.done.wait [#allocation9], 2080  }
  0x7d   :  { %1713 = vsyncadd [#allocation9], 4294965216 }
  0x7e   :  { %1714 = dma.done.wait [#allocation12], 1040  }
  0x7f   :  { %1715 = vsyncadd [#allocation12], 4294966256  ;;  %v1729_v0 = vmov 0   ;;  %v117_v1 = vld [vmem:[#allocation2 + $0x10] sm:$0xff]  ;;  %v115_v2 = vld [vmem:[#allocation2] sm:$0xff]  ;;  %v1730_v6 = vmov 1  }
  0x80   :  { %1401 = vset.pattern.permute.xlu1 %v1729_v0  ;;  %1400 = vset.pattern.permute.xlu0 %v1729_v0  ;;  %v118_v3 = vld [vmem:[#allocation2 + $0x18] sm:$0xff]  ;;  %v116_v4 = vld [vmem:[#allocation2 + $0x8] sm:$0xff]  ;;  %v1731_v7 = vmov 2   ;;  %v119_v8 = vld [vmem:[#allocation2 + $0x20] sm:$0xff]  ;;  %v1732_v10 = vmov 3   ;;  %s1733_s6 = smov [#allocation14]  }
  0x81   :  { %143 = vperm.xlu1 %1401, %v117_v1   ;;  %133 = vperm.xlu0 %1400, %v115_v2   ;;  %v120_v5 = vld [vmem:[#allocation2 + $0x28] sm:$0xff]  ;;  %v122_v9 = vld [vmem:[#allocation2 + $0x38] sm:$0xff]  ;;  %v121_v11 = vld [vmem:[#allocation2 + $0x30] sm:$0xff]  ;;  %s1213_s0 = sshll.u32 %s1733_s6, 4  ;;  %s1214_s0 = int_to_ptr.vmem [resolvable:$true] %s1213_s0 }
  0x82   :  { %v1412_v12 = vld [vmem:[#allocation8] sm:$0xff]   ;;  %v1413_v13 = vld [vmem:[#allocation8 + $0x8] sm:$0xff]   ;;  %v1414_v14 = vld [vmem:[#allocation8 + $0x10] sm:$0xff]   ;;  %s1686_s30 = scalar_lea.vmem %s1214_s0, 1024  ;;  %p1691_p1 = scmp.lt.s32.totalorder %s1214_s0, %s1214_s0 }
  0x83   :  { %1296 = vmatprep.subr.bf16.mxu0 %v1412_v12  ;;  %v1415_v15 = vld [vmem:[#allocation8 + $0x18] sm:$0xff]   ;;  %v1416_v16 = vld [vmem:[#allocation8 + $0x20] sm:$0xff]   ;;  %v1417_v17 = vld [vmem:[#allocation8 + $0x28] sm:$0xff]   ;;  %p1687_p0 = scmp.ne.s32.totalorder %s1214_s0, %s1686_s30  ;;  %p1692_p2 = scmp.lt.s32.totalorder %s1686_s30, %s1686_s30 }
  0x84   :  { %1297 = vmatpush3.bf16.msra.mxu0 %v1412_v12  ;;  %v1418_v18 = vld [vmem:[#allocation8 + $0x30] sm:$0xff]   ;;  %v1419_v19 = vld [vmem:[#allocation8 + $0x38] sm:$0xff]  }
  0x85   :  { %148 = vperm.xlu1 %1401, %v118_v3   ;;  %138 = vperm.xlu0 %1400, %v116_v4   ;;  %v1879_v31 = vld [vmem:[#allocation5] ss:$0 sm:$0xff]  ;;  %v1882_v34 = vld [vmem:[#allocation5 + $0x1] ss:$0 sm:$0xff]  ;;  %v1886_v36 = vld [vmem:[#allocation7] ss:$0 sm:$0xff]  ;;  %p1693_p3 = por %p1692_p2, %p1691_p1 }
  0x86   :  { %1298 = vmatprep.subr.bf16.mxu0 %v1413_v13  ;;  %v1892_v42 = vld [vmem:[#allocation5 + $0x3] ss:$0 sm:$0xff]  ;;  %v1895_v44 = vld [vmem:[#allocation5 + $0x2] ss:$0 sm:$0xff] }
  0x87   :  { %p1694_p4 = pnand %p1693_p3, %p1687_p0 }
  0x88   :  { %1299 = vmatpush3.bf16.msra.mxu0 %v1413_v13 }
  0x89   :  { %1402 = vset.pattern.permute.xlu1 %v1730_v6  ;;  %158 = vperm.xlu0 %1400, %v120_v5  }
  0x8a   :  { %197 = vperm.xlu1 %1402, %v116_v4   ;;  %1300 = vmatprep.subr.bf16.mxu0 %v1414_v14 }
  0x8c   :  { %1301 = vmatpush3.bf16.msra.mxu0 %v1414_v14 }
  0x8d   :  { %1406 = vset.pattern.permute.xlu0 %v1730_v6  ;;  %1302 = vmatprep.subr.bf16.mxu0 %v1415_v15 }
  0x8e   :  { %201 = vperm.xlu1 %1402, %v117_v1   ;;  %193 = vperm.xlu0 %1406, %v115_v2  }
  0x90   :  { %1303 = vmatpush3.bf16.msra.mxu0 %v1415_v15 }
  0x91   :  { %1304 = vmatprep.subr.bf16.mxu0 %v1416_v16 }
  0x92   :  { %1403 = vset.pattern.permute.xlu1 %v1731_v7  ;;  %205 = vperm.xlu0 %1406, %v118_v3  }
  0x93   :  { %246 = vperm.xlu1 %1403, %v115_v2  }
  0x94   :  { %1305 = vmatpush3.bf16.msra.mxu0 %v1416_v16 }
  0x95   :  { %1306 = vmatprep.subr.bf16.mxu0 %v1417_v17 }
  0x96   :  { %209 = vperm.xlu0 %1406, %v119_v8  }
  0x97   :  { %254 = vperm.xlu1 %1403, %v117_v1  }
  0x98   :  { %1307 = vmatpush3.bf16.msra.mxu0 %v1417_v17 }
  0x99   :  { %1308 = vmatprep.subr.bf16.mxu0 %v1418_v18 }
  0x9a   :  { %221 = vperm.xlu0 %1406, %v122_v9  }
  0x9b   :  { %258 = vperm.xlu1 %1403, %v118_v3  }
  0x9c   :  { %1309 = vmatpush3.bf16.msra.mxu0 %v1418_v18 }
  0x9d   :  { %1310 = vmatprep.subr.bf16.mxu0 %v1419_v19 }
  0x9e   :  { %1408 = vset.pattern.permute.xlu0 %v1731_v7 }
  0x9f   :  { %1404 = vset.pattern.permute.xlu1 %v1732_v10  ;;  %250 = vperm.xlu0 %1408, %v116_v4  }
  0xa0   :  { %303 = vperm.xlu1 %1404, %v116_v4   ;;  %1311 = vmatpush3.bf16.msra.mxu0 %v1419_v19 }
  0xa3   :  { %266 = vperm.xlu0 %1408, %v120_v5  }
  0xa4   :  { %307 = vperm.xlu1 %1404, %v117_v1  }
  0xa7   :  { %1410 = vset.pattern.permute.xlu0 %v1732_v10 }
  0xa8   :  { %1405 = vset.pattern.permute.xlu1 %v1729_v0  ;;  %299 = vperm.xlu0 %1410, %v115_v2  }
  0xa9   :  { %153 = vperm.xlu1 %1405, %v119_v8  }
  0xac   :  { %311 = vperm.xlu0 %1410, %v118_v3  }
  0xad   :  { %163 = vperm.xlu1 %1405, %v121_v11  }
  0xb0   :  { %315 = vperm.xlu0 %1410, %v119_v8  }
  0xb1   :  { %168 = vperm.xlu1 %1405, %v122_v9  }
  0xb4   :  { %327 = vperm.xlu0 %1410, %v122_v9  }
  0xb5   :  { %1407 = vset.pattern.permute.xlu1 %v1730_v6 }
  0xb6   :  { %213 = vperm.xlu1 %1407, %v120_v5  }
  0xba   :  { %217 = vperm.xlu1 %1407, %v121_v11  }
  0xbe   :  { %1409 = vset.pattern.permute.xlu1 %v1731_v7 }
  0xbf   :  { %262 = vperm.xlu1 %1409, %v119_v8  }
  0xc3   :  { %270 = vperm.xlu1 %1409, %v121_v11  }
  0xc7   :  { %274 = vperm.xlu1 %1409, %v122_v9  }
  0xcb   :  { %1411 = vset.pattern.permute.xlu1 %v1732_v10 }
  0xcc   :  { %319 = vperm.xlu1 %1411, %v120_v5  }
  0xd0   :  { %323 = vperm.xlu1 %1411, %v121_v11  }
 0x100   :  { %v144_v20 = vpop.permute.xlu1 %143  ;;  %v134_v21 = vpop.permute.xlu0 %133 }
 0x101   :  { %v177_v38 = vmul.f32 %v1879_v31, %v144_v20  ;;  %v175_v41 = vmul.f32 %v1879_v31, %v134_v21 }
 0x103   :  { %v185_v46 = vadd.f32 %v1886_v36, %v177_v38  ;;  %v183_v50 = vadd.f32 %v1886_v36, %v175_v41 }
 0x104   :  { %v149_v22 = vpop.permute.xlu1 %148  ;;  %v139_v23 = vpop.permute.xlu0 %138 }
 0x105   :  { %v176_v33 = vmul.f32 %v1879_v31, %v139_v23  ;;  %v178_v57 = vmul.f32 %v1879_v31, %v149_v22 }
 0x107   :  { %v184_v39 = vadd.f32 %v1886_v36, %v176_v33  ;;  %v186_v3 = vadd.f32 %v1886_v36, %v178_v57 }
 0x108   :  { %v1875_v24 = vpop.permute.xlu0 %158 }
 0x109   :  { %v198_v25 = vpop.permute.xlu1 %197 }
 0x10a   :  { %v229_v40 = vmul.f32 %v1882_v34, %v198_v25 }
 0x10c   :  { %v237_v47 = vadd.f32 %v229_v40, %v184_v39 }
 0x10d   :  { %v202_v26 = vpop.permute.xlu1 %201  ;;  %v194_v27 = vpop.permute.xlu0 %193 }
 0x10e   :  { %v230_v43 = vmul.f32 %v1882_v34, %v202_v26  ;;  %v228_v51 = vmul.f32 %v1882_v34, %v194_v27 }
 0x110   :  { %v238_v55 = vadd.f32 %v230_v43, %v185_v46  ;;  %v236_v60 = vadd.f32 %v228_v51, %v183_v50  ;;  %v180_v46 = vmul.f32 %v1879_v31, %v1875_v24 }
 0x111   :  { %v206_v28 = vpop.permute.xlu0 %205 }
 0x112   :  { %v247_v29 = vpop.permute.xlu1 %246  ;;  %v231_v1 = vmul.f32 %v1882_v34, %v206_v28 }
 0x113   :  { %v281_v61 = vmul.f32 %v1895_v44, %v247_v29 }
 0x114   :  { %v239_v12 = vadd.f32 %v231_v1, %v186_v3 }
 0x115   :  { %v1877_v30 = vpop.permute.xlu0 %209  ;;  %v289_v6 = vadd.f32 %v281_v61, %v236_v60 }
 0x116   :  { %v255_v32 = vpop.permute.xlu1 %254  ;;  %v232_v41 = vmul.f32 %v1882_v34, %v1877_v30 }
 0x117   :  { %v283_v52 = vmul.f32 %v1895_v44, %v255_v32 }
 0x119   :  { %v1884_v35 = vpop.permute.xlu0 %221  ;;  %v291_v62 = vadd.f32 %v283_v52, %v238_v55  ;;  %v188_v55 = vadd.f32 %v1886_v36, %v180_v46 }
 0x11a   :  { %v259_v37 = vpop.permute.xlu1 %258  ;;  %v235_v24 = vmul.f32 %v1882_v34, %v1884_v35 }
 0x11b   :  { %v284_v7 = vmul.f32 %v1895_v44, %v259_v37 }
 0x11d   :  { %v292_v16 = vadd.f32 %v284_v7, %v239_v12 }
 0x11e   :  { %v251_v45 = vpop.permute.xlu0 %250 }
 0x11f   :  { %v282_v48 = vmul.f32 %v1895_v44, %v251_v45  ;;  %v304_v49 = vpop.permute.xlu1 %303 }
 0x120   :  { %v335_v53 = vmul.f32 %v1892_v42, %v304_v49 }
 0x121   :  { %v290_v54 = vadd.f32 %v282_v48, %v237_v47 }
 0x122   :  { %v1903_v56 = vpop.permute.xlu0 %266 }
 0x123   :  { %v1906_v58 = vadd.f32 %v335_v53, %v290_v54  ;;  %v308_v59 = vpop.permute.xlu1 %307  ;;  %v286_v60 = vmul.f32 %v1895_v44, %v1903_v56 }
 0x124   :  { %v336_v63 = vmul.f32 %v1892_v42, %v308_v59 }
 0x125   :  { %v375_v0 = vand.u32 2147483647, %v1906_v58  ;;  %v351_v56 = vmax.f32 %v1906_v58, 0.0  ;;  %vm359_vm1 = vcmp.ne.f32.partialorder %v1906_v58, %v1906_v58 }
 0x126   :  { %v1912_v2 = vadd.f32 %v336_v63, %v291_v62 }
 0x127   :  { %v383_v4 = vsub.f32 0.0, %v375_v0  ;;  %v300_v5 = vpop.permute.xlu0 %299 }
 0x128   :  { %v376_v8 = vand.u32 2147483647, %v1912_v2  ;;  %v334_v9 = vmul.f32 %v1892_v42, %v300_v5  ;;  %v154_v10 = vpop.permute.xlu1 %153  ;;  %v352_v7 = vmax.f32 %v1912_v2, 0.0  ;;  %vm360_vm6 = vcmp.ne.f32.partialorder %v1912_v2, %v1912_v2 }
 0x129   :  { %v392_v11 = vmul.f32 1.442695, %v383_v4  ;;  %v179_v37 = vmul.f32 %v1879_v31, %v154_v10 }
 0x12a   :  { %v384_v13 = vsub.f32 0.0, %v376_v8  ;;  %v1918_v14 = vadd.f32 %v334_v9, %v289_v6 }
 0x12b   :  { %1436 = vpow2.f32 %v392_v11  ;;  %v312_v15 = vpop.permute.xlu0 %311  ;;  %v187_v43 = vadd.f32 %v1886_v36, %v179_v37 }
 0x12c   :  { %v394_v17 = vmul.f32 1.442695, %v384_v13  ;;  %v374_v18 = vand.u32 2147483647, %v1918_v14  ;;  %v337_v19 = vmul.f32 %v1892_v42, %v312_v15  ;;  %v164_v20 = vpop.permute.xlu1 %163  ;;  %v350_v9 = vmax.f32 %v1918_v14, 0.0 }
 0x12d   :  { %v240_v52 = vadd.f32 %v232_v41, %v187_v43  ;;  %v181_v61 = vmul.f32 %v1879_v31, %v164_v20  ;;  %vm358_vm0 = vcmp.ne.f32.partialorder %v1918_v14, %v1918_v14 }
 0x12e   :  { %1438 = vpow2.f32 %v394_v17  ;;  %v382_v21 = vsub.f32 0.0, %v374_v18  ;;  %v1922_v22 = vadd.f32 %v337_v19, %v292_v16 }
 0x12f   :  { %v316_v47 = vpop.permute.xlu0 %315  ;;  %v189_v12 = vadd.f32 %v1886_v36, %v181_v61 }
 0x130   :  { %v390_v23 = vmul.f32 1.442695, %v382_v21  ;;  %v377_v25 = vand.u32 2147483647, %v1922_v22  ;;  %v169_v26 = vpop.permute.xlu1 %168  ;;  %v338_v30 = vmul.f32 %v1892_v42, %v316_v47  ;;  %vm361_vm7 = vcmp.ne.f32.partialorder %v1922_v22, %v1922_v22 }
 0x131   :  { %v182_v49 = vmul.f32 %v1879_v31, %v169_v26 }
 0x132   :  { %1440 = vpow2.f32 %v390_v23  ;;  %v385_v27 = vsub.f32 0.0, %v377_v25 }
 0x133   :  { %v190_v1 = vadd.f32 %v1886_v36, %v182_v49  ;;  %v328_v4 = vpop.permute.xlu0 %327 }
 0x134   :  { %v396_v28 = vmul.f32 1.442695, %v385_v27  ;;  %v341_v15 = vmul.f32 %v1892_v42, %v328_v4 }
 0x135   :  { %v1437_v29 = vpop.eup %1436  ;;  %v214_v32 = vpop.permute.xlu1 %213  ;;  %v243_v19 = vadd.f32 %v235_v24, %v190_v1 }
 0x136   :  { %1442 = vpow2.f32 %v396_v28  ;;  %v415_v33 = vadd.f32 1.0, %v1437_v29  ;;  %v418_v51 = vmul.f32 -0.5, %v1437_v29  ;;  %v233_v57 = vmul.f32 %v1882_v34, %v214_v32 }
 0x137   :  { %v421_v6 = vand.u32 2147483647, %v1437_v29 }
 0x138   :  { %v1926_v38 = vpop.eup %1438  ;;  %1444 = vlog2.f32 %v415_v33  ;;  %v419_v35 = vadd.f32 1.0, %v418_v51  ;;  %v241_v31 = vadd.f32 %v233_v57, %v188_v55 }
 0x139   :  { %v218_v39 = vpop.permute.xlu1 %217  ;;  %v424_v40 = vadd.f32 1.0, %v1926_v38  ;;  %v427_v59 = vmul.f32 -0.5, %v1926_v38  ;;  %vm1966_vm2 = vcmp.lt.f32.partialorder %v421_v6, 0.0004427343  ;;  %v430_v26 = vand.u32 2147483647, %v1926_v38 }
 0x13a   :  { %v420_v21 = vmul.f32 %v1437_v29, %v419_v35  ;;  %v234_v28 = vmul.f32 %v1882_v34, %v218_v39  ;;  %v294_v32 = vadd.f32 %v286_v60, %v241_v31 }
 0x13b   :  { %1446 = vlog2.f32 %v424_v40  ;;  %v428_v11 = vadd.f32 1.0, %v427_v59  ;;  %vm1989_vm4 = vcmp.lt.f32.partialorder %v430_v26, 0.0004427343 }
 0x13c   :  { %v1932_v45 = vpop.eup %1440 }
 0x13d   :  { %v406_v48 = vadd.f32 1.0, %v1932_v45  ;;  %v409_v5 = vmul.f32 -0.5, %v1932_v45  ;;  %v412_v16 = vand.u32 2147483647, %v1932_v45  ;;  %v429_v37 = vmul.f32 %v1926_v38, %v428_v11 }
 0x13e   :  { %v263_v50 = vpop.permute.xlu1 %262 }
 0x13f   :  { %v285_v53 = vmul.f32 %v1895_v44, %v263_v50  ;;  %1448 = vlog2.f32 %v406_v48  ;;  %v410_v20 = vadd.f32 1.0, %v409_v5  ;;  %vm1977_vm3 = vcmp.lt.f32.partialorder %v412_v16, 0.0004427343 }
 0x140   :  { %v1940_v54 = vpop.eup %1442 }
 0x141   :  { %v293_v62 = vadd.f32 %v285_v53, %v240_v52  ;;  %v433_v63 = vadd.f32 1.0, %v1940_v54  ;;  %v436_v27 = vmul.f32 -0.5, %v1940_v54  ;;  %v411_v49 = vmul.f32 %v1932_v45, %v410_v20 }
 0x142   :  { %v1445_v0 = vpop.eup %1444  ;;  %v271_v3 = vpop.permute.xlu1 %270  ;;  %v439_v34 = vand.u32 2147483647, %v1940_v54  ;;  %v242_v52 = vadd.f32 %v234_v28, %v189_v12  ;;  %v353_v45 = vmax.f32 %v1922_v22, 0.0 }
 0x143   :  { %v1954_v8 = vadd.f32 %v338_v30, %v293_v62  ;;  %1450 = vlog2.f32 %v433_v63  ;;  %v417_v10 = vmul.f32 0.6931472, %v1445_v0  ;;  %v287_v47 = vmul.f32 %v1895_v44, %v271_v3 }
 0x144   :  { %v437_v51 = vadd.f32 1.0, %v436_v27  ;;  %vm440_vm5 = vcmp.lt.f32.partialorder %v439_v34, 0.0004427343 }
 0x145   :  { %v378_v13 = vand.u32 2147483647, %v1954_v8  ;;  %v1447_v17 = vpop.eup %1446  ;;  %v423_v33 = vsel %vm1966_vm2, %v420_v21, %v417_v10  ;;  %v295_v60 = vadd.f32 %v287_v47, %v242_v52  ;;  %v354_v34 = vmax.f32 %v1954_v8, 0.0 }
 0x146   :  { %v275_v18 = vpop.permute.xlu1 %274  ;;  %v426_v46 = vmul.f32 0.6931472, %v1447_v17  ;;  %v479_v38 = vadd.f32 %v423_v33, %v351_v56  ;;  %v438_v4 = vmul.f32 %v1940_v54, %v437_v51  ;;  %vm362_vm11 = vcmp.ne.f32.partialorder %v1954_v8, %v1954_v8 }
 0x147   :  { %v386_v36 = vsub.f32 0.0, %v378_v13  ;;  %v288_v25 = vmul.f32 %v1895_v44, %v275_v18 }
 0x148   :  { %v432_v59 = vsel %vm1989_vm4, %v429_v37, %v426_v46  ;;  %v487_v3 = vsel %vm359_vm1, %v1906_v58, %v479_v38 }
 0x149   :  { %v1449_v29 = vpop.eup %1448  ;;  %v398_v40 = vmul.f32 1.442695, %v386_v36  ;;  %v296_v41 = vadd.f32 %v288_v25, %v243_v19  ;;  %v480_v56 = vadd.f32 %v432_v59, %v352_v7 }
 0x14a   :  { %v408_v48 = vmul.f32 0.6931472, %v1449_v29 }
 0x14b   :  { %1452 = vpow2.f32 %v398_v40  ;;  %v1984_v39 = vadd.f32 %v341_v15, %v296_v41  ;;  %v320_v50 = vpop.permute.xlu1 %319  ;;  %v488_v54 = vsel %vm360_vm6, %v1912_v2, %v480_v56 }
 0x14c   :  { %v339_v53 = vmul.f32 %v1892_v42, %v320_v50  ;;  %v414_v30 = vsel %vm1977_vm3, %v411_v49, %v408_v48 }
 0x14d   :  { %v1451_v44 = vpop.eup %1450  ;;  %v381_v24 = vand.u32 2147483647, %v1984_v39  ;;  %v478_v57 = vadd.f32 %v414_v30, %v350_v9  ;;  %v357_v59 = vmax.f32 %v1984_v39, 0.0  ;;  %vm365_vm15 = vcmp.ne.f32.partialorder %v1984_v39, %v1984_v39 }
 0x14e   :  { %v1997_v61 = vadd.f32 %v339_v53, %v294_v32  ;;  %v435_v62 = vmul.f32 0.6931472, %v1451_v44 }
 0x14f   :  { %v389_v63 = vsub.f32 0.0, %v381_v24  ;;  %v324_v0 = vpop.permute.xlu1 %323  ;;  %v486_v1 = vsel %vm358_vm0, %v1918_v14, %v478_v57 }
 0x150   :  { %v379_v5 = vand.u32 2147483647, %v1997_v61  ;;  %v340_v35 = vmul.f32 %v1892_v42, %v324_v0  ;;  %v494_v6 = vpack.c.bf16 %v487_v3, %v486_v1  ;;  %v441_v9 = vsel %vm440_vm5, %v438_v4, %v435_v62 }
 0x151   :  { %v404_v31 = vmul.f32 1.442695, %v389_v63  ;;  %v481_v14 = vadd.f32 %v441_v9, %v353_v45  ;;  %v355_v50 = vmax.f32 %v1997_v61, 0.0  ;;  %vm363_vm12 = vcmp.ne.f32.partialorder %v1997_v61, %v1997_v61  ;;  %v1422_v9 = vld [vmem:[#allocation8 + $0x50] sm:$0xff]  }
 0x152   :  { %v387_v10 = vsub.f32 0.0, %v379_v5  ;;  %v2012_v11 = vadd.f32 %v340_v35, %v295_v60  ;;  %1312 = vmatprep.mubr.bf16.mxu0 %v494_v6 }
 0x153   :  { %1454 = vpow2.f32 %v404_v31  ;;  %v489_v7 = vsel %vm361_vm7, %v1922_v22, %v481_v14  ;;  %v1424_v14 = vld [vmem:[#allocation8 + $0x60] sm:$0xff]  }
 0x154   :  { %v400_v58 = vmul.f32 1.442695, %v387_v10  ;;  %v380_v42 = vand.u32 2147483647, %v2012_v11  ;;  %v495_v13 = vpack.c.bf16 %v489_v7, %v488_v54  ;;  %v356_v60 = vmax.f32 %v2012_v11, 0.0  ;;  %v1423_v10 = vld [vmem:[#allocation8 + $0x58] sm:$0xff]  }
 0x155   :  { %v1453_v12 = vpop.eup %1452  ;;  %vm364_vm14 = vcmp.ne.f32.partialorder %v2012_v11, %v2012_v11 }
 0x156   :  { %1456 = vpow2.f32 %v400_v58  ;;  %v388_v15 = vsub.f32 0.0, %v380_v42  ;;  %1313 = vmatmul.mubr.bf16.vlgmr.msra.gmra.mrb[0].mxu0 %v495_v13  ;;  %v442_v16 = vadd.f32 1.0, %v1453_v12  ;;  %v445_v23 = vmul.f32 -0.5, %v1453_v12  ;;  %v1425_v58 = vld [vmem:[#allocation8 + $0x68] sm:$0xff]   ;;  %v2037_v42 = vld [vmem:[#allocation10] ss:$0 sm:$0xff] }
 0x157   :  { %v448_v28 = vand.u32 2147483647, %v1453_v12 }
 0x158   :  { %v402_v17 = vmul.f32 1.442695, %v388_v15  ;;  %v446_v22 = vadd.f32 1.0, %v445_v23 }
 0x159   :  { %vm449_vm8 = vcmp.lt.f32.partialorder %v448_v28, 0.0004427343 }
 0x15a   :  { %1458 = vpow2.f32 %v402_v17  ;;  %v447_v37 = vmul.f32 %v1453_v12, %v446_v22 }
 0x15b   :  { %1460 = vlog2.f32 %v442_v16 }
 0x15d   :  { %v1455_v18 = vpop.eup %1454 }
 0x15e   :  { %v469_v19 = vadd.f32 1.0, %v1455_v18  ;;  %v472_v27 = vmul.f32 -0.5, %v1455_v18  ;;  %v475_v46 = vand.u32 2147483647, %v1455_v18 }
 0x160   :  { %v1457_v20 = vpop.eup %1456  ;;  %1462 = vlog2.f32 %v469_v19  ;;  %v473_v41 = vadd.f32 1.0, %v472_v27  ;;  %vm476_vm10 = vcmp.lt.f32.partialorder %v475_v46, 0.0004427343 }
 0x161   :  { %v451_v21 = vadd.f32 1.0, %v1457_v20  ;;  %v454_v26 = vmul.f32 -0.5, %v1457_v20  ;;  %v457_v43 = vand.u32 2147483647, %v1457_v20 }
 0x162   :  { %v474_v53 = vmul.f32 %v1455_v18, %v473_v41 }
 0x163   :  { %1464 = vlog2.f32 %v451_v21  ;;  %v455_v29 = vadd.f32 1.0, %v454_v26  ;;  %vm458_vm9 = vcmp.lt.f32.partialorder %v457_v43, 0.0004427343 }
 0x164   :  { %v1459_v36 = vpop.eup %1458 }
 0x165   :  { %v1461_v2 = vpop.eup %1460  ;;  %v460_v25 = vadd.f32 1.0, %v1459_v36  ;;  %v463_v40 = vmul.f32 -0.5, %v1459_v36  ;;  %v456_v51 = vmul.f32 %v1457_v20, %v455_v29  ;;  %v466_v55 = vand.u32 2147483647, %v1459_v36 }
 0x166   :  { %v444_v32 = vmul.f32 0.6931472, %v1461_v2 }
 0x167   :  { %1466 = vlog2.f32 %v460_v25  ;;  %v464_v52 = vadd.f32 1.0, %v463_v40  ;;  %vm467_vm13 = vcmp.lt.f32.partialorder %v466_v55, 0.0004427343 }
 0x168   :  { %v450_v47 = vsel %vm449_vm8, %v447_v37, %v444_v32 }
 0x169   :  { %v482_v30 = vadd.f32 %v450_v47, %v354_v34  ;;  %v465_v63 = vmul.f32 %v1459_v36, %v464_v52 }
 0x16a   :  { %v1463_v33 = vpop.eup %1462 }
 0x16b   :  { %v471_v48 = vmul.f32 0.6931472, %v1463_v33  ;;  %v490_v0 = vsel %vm362_vm11, %v1954_v8, %v482_v30  ;;  %v1420_v8 = vld [vmem:[#allocation8 + $0x40] sm:$0xff]  }
 0x16c   :  { %1320 = vmatprep.subr.bf16.mxu1 %v1420_v8 }
 0x16d   :  { %v1465_v49 = vpop.eup %1464  ;;  %v477_v45 = vsel %vm476_vm10, %v474_v53, %v471_v48  ;;  %1321 = vmatpush3.bf16.msra.mxu1 %v1420_v8 }
 0x16e   :  { %v453_v38 = vmul.f32 0.6931472, %v1465_v49  ;;  %v485_v3 = vadd.f32 %v477_v45, %v357_v59 }
 0x170   :  { %v459_v44 = vsel %vm458_vm9, %v456_v51, %v453_v38  ;;  %v493_v56 = vsel %vm365_vm15, %v1984_v39, %v485_v3  ;;  %v1426_v39 = vld [vmem:[#allocation8 + $0x70] sm:$0xff]  }
 0x171   :  { %v1467_v24 = vpop.eup %1466  ;;  %v483_v57 = vadd.f32 %v459_v44, %v355_v50 }
 0x172   :  { %v462_v62 = vmul.f32 0.6931472, %v1467_v24 }
 0x173   :  { %v491_v1 = vsel %vm363_vm12, %v1997_v61, %v483_v57  ;;  %v1421_v61 = vld [vmem:[#allocation8 + $0x48] sm:$0xff]  }
 0x174   :  { %v496_v4 = vpack.c.bf16 %v491_v1, %v490_v0  ;;  %v468_v5 = vsel %vm467_vm13, %v465_v63, %v462_v62  ;;  %1322 = vmatprep.subr.bf16.mxu1 %v1421_v61 }
 0x175   :  { %v484_v35 = vadd.f32 %v468_v5, %v356_v60  ;;  %1323 = vmatpush3.bf16.msra.mxu1 %v1421_v61 }
 0x176   :  { %1316 = vmatprep.mubr.bf16.mxu0 %v496_v4  ;;  %1324 = vmatprep.subr.bf16.mxu1 %v1422_v9 }
 0x177   :  { %v492_v6 = vsel %vm364_vm14, %v2012_v11, %v484_v35  ;;  %v1427_v11 = vld [vmem:[#allocation8 + $0x78] sm:$0xff]  }
 0x178   :  { %v497_v31 = vpack.c.bf16 %v493_v56, %v492_v6 }
 0x179   :  { %1325 = vmatpush3.bf16.msra.mxu1 %v1422_v9 }
 0x17a   :  { %1317 = vmatmul.mubr.bf16.gmra.mrb[4].mxu0 %v497_v31  ;;  %1326 = vmatprep.subr.bf16.mxu1 %v1423_v10 }
 0x17d   :  { %1327 = vmatpush3.bf16.msra.mxu1 %v1423_v10 }
 0x17e   :  { %1328 = vmatprep.subr.bf16.mxu1 %v1424_v14 }
 0x181   :  { %1329 = vmatpush3.bf16.msra.mxu1 %v1424_v14 }
 0x182   :  { %1330 = vmatprep.subr.bf16.mxu1 %v1425_v58 }
 0x185   :  { %1331 = vmatpush3.bf16.msra.mxu1 %v1425_v58 }
 0x186   :  { %1332 = vmatprep.subr.bf16.mxu1 %v1426_v39 }
 0x189   :  { %1333 = vmatpush3.bf16.msra.mxu1 %v1426_v39 }
 0x18a   :  { %1334 = vmatprep.subr.bf16.mxu1 %v1427_v11 }
 0x18d   :  { %1335 = vmatpush3.bf16.msra.mxu1 %v1427_v11 }
 0x229   :  { %v1314_v54 = vpop.f32.mrb[0].mxu0 }
 0x22a   :  { %v2040_v7 = vadd.f32 %v1314_v54, %v2037_v42  ;;  %v601_v12 = vpop.f32.mrb[1].mxu0 }
 0x22b   :  { %v2043_v13 = vadd.f32 %v2037_v42, %v601_v12  ;;  %v1315_v15 = vpop.f32.mrb[2].mxu0 }
 0x22c   :  { %v658_v16 = vand.u32 2147483647, %v2040_v7  ;;  %v2047_v17 = vadd.f32 %v1315_v15, %v2037_v42  ;;  %v604_v18 = vpop.f32.mrb[3].mxu0  ;;  %v634_v44 = vmax.f32 %v2040_v7, 0.0  ;;  %vm642_vm6 = vcmp.ne.f32.partialorder %v2040_v7, %v2040_v7 }
 0x22d   :  { %v656_v19 = vand.u32 2147483647, %v2043_v13  ;;  %v2051_v20 = vadd.f32 %v2037_v42, %v604_v18  ;;  %v632_v45 = vmax.f32 %v2043_v13, 0.0  ;;  %vm640_vm0 = vcmp.ne.f32.partialorder %v2043_v13, %v2043_v13 }
 0x22e   :  { %v666_v21 = vsub.f32 0.0, %v658_v16  ;;  %v659_v23 = vand.u32 2147483647, %v2047_v17  ;;  %v635_v59 = vmax.f32 %v2047_v17, 0.0  ;;  %vm643_vm7 = vcmp.ne.f32.partialorder %v2047_v17, %v2047_v17 }
 0x22f   :  { %v664_v36 = vsub.f32 0.0, %v656_v19  ;;  %v657_v2 = vand.u32 2147483647, %v2051_v20  ;;  %v633_v6 = vmax.f32 %v2051_v20, 0.0  ;;  %vm641_vm5 = vcmp.ne.f32.partialorder %v2051_v20, %v2051_v20 }
 0x230   :  { %v676_v25 = vmul.f32 1.442695, %v666_v21  ;;  %v667_v22 = vsub.f32 0.0, %v659_v23 }
 0x231   :  { %v672_v26 = vmul.f32 1.442695, %v664_v36  ;;  %v665_v27 = vsub.f32 0.0, %v657_v2 }
 0x232   :  { %1468 = vpow2.f32 %v676_v25  ;;  %v678_v28 = vmul.f32 1.442695, %v667_v22 }
 0x233   :  { %1470 = vpow2.f32 %v672_v26  ;;  %v674_v32 = vmul.f32 1.442695, %v665_v27 }
 0x234   :  { %1472 = vpow2.f32 %v678_v28 }
 0x235   :  { %1474 = vpow2.f32 %v674_v32 }
 0x23c   :  { %v1469_v33 = vpop.eup %1468 }
 0x23d   :  { %v1471_v37 = vpop.eup %1470  ;;  %v706_v29 = vadd.f32 1.0, %v1469_v33  ;;  %v709_v49 = vmul.f32 -0.5, %v1469_v33  ;;  %v712_v50 = vand.u32 2147483647, %v1469_v33 }
 0x23e   :  { %v1473_v40 = vpop.eup %1472  ;;  %v688_v41 = vadd.f32 1.0, %v1471_v37  ;;  %v691_v48 = vmul.f32 -0.5, %v1471_v37  ;;  %v694_v52 = vand.u32 2147483647, %v1471_v37 }
 0x23f   :  { %v1475_v43 = vpop.eup %1474  ;;  %1476 = vlog2.f32 %v706_v29  ;;  %v715_v46 = vadd.f32 1.0, %v1473_v40  ;;  %v718_v38 = vmul.f32 -0.5, %v1473_v40  ;;  %v710_v30 = vadd.f32 1.0, %v709_v49 }
 0x240   :  { %1478 = vlog2.f32 %v688_v41  ;;  %v697_v47 = vadd.f32 1.0, %v1475_v43  ;;  %v700_v34 = vmul.f32 -0.5, %v1475_v43  ;;  %v692_v51 = vadd.f32 1.0, %v691_v48 }
 0x241   :  { %1480 = vlog2.f32 %v715_v46  ;;  %v703_v53 = vand.u32 2147483647, %v1475_v43  ;;  %vm2060_vm1 = vcmp.lt.f32.partialorder %v712_v50, 0.0004427343  ;;  %v719_v63 = vadd.f32 1.0, %v718_v38 }
 0x242   :  { %1482 = vlog2.f32 %v697_v47  ;;  %v701_v24 = vadd.f32 1.0, %v700_v34  ;;  %v693_v3 = vmul.f32 %v1471_v37, %v692_v51  ;;  %vm695_vm2 = vcmp.lt.f32.partialorder %v694_v52, 0.0004427343 }
 0x243   :  { %v721_v4 = vand.u32 2147483647, %v1473_v40  ;;  %vm2065_vm3 = vcmp.lt.f32.partialorder %v703_v53, 0.0004427343  ;;  %v711_v31 = vmul.f32 %v1469_v33, %v710_v30  ;;  %v720_v15 = vmul.f32 %v1473_v40, %v719_v63 }
 0x244   :  { %v702_v58 = vmul.f32 %v1475_v43, %v701_v24 }
 0x245   :  { %vm2083_vm4 = vcmp.lt.f32.partialorder %v721_v4, 0.0004427343 }
 0x249   :  { %v1477_v55 = vpop.eup %1476 }
 0x24a   :  { %v1479_v57 = vpop.eup %1478  ;;  %v708_v60 = vmul.f32 0.6931472, %v1477_v55 }
 0x24b   :  { %v1481_v0 = vpop.eup %1480  ;;  %v690_v1 = vmul.f32 0.6931472, %v1479_v57 }
 0x24c   :  { %v1483_v5 = vpop.eup %1482  ;;  %v717_v8 = vmul.f32 0.6931472, %v1481_v0  ;;  %v714_v12 = vsel %vm2060_vm1, %v711_v31, %v708_v60 }
 0x24d   :  { %v1318_v35 = vpop.f32.mrb[4].mxu0  ;;  %v696_v10 = vsel %vm695_vm2, %v693_v3, %v690_v1  ;;  %v699_v14 = vmul.f32 0.6931472, %v1483_v5  ;;  %v762_v28 = vadd.f32 %v714_v12, %v634_v44 }
 0x24e   :  { %v2070_v61 = vadd.f32 %v1318_v35, %v2037_v42  ;;  %v617_v9 = vpop.f32.mrb[5].mxu0  ;;  %v760_v54 = vadd.f32 %v696_v10, %v632_v45  ;;  %v723_v22 = vsel %vm2083_vm4, %v720_v15, %v717_v8 }
 0x24f   :  { %v2073_v39 = vadd.f32 %v2037_v42, %v617_v9  ;;  %v1319_v11 = vpop.f32.mrb[6].mxu0  ;;  %v705_v21 = vsel %vm2065_vm3, %v702_v58, %v699_v14  ;;  %v763_v43 = vadd.f32 %v723_v22, %v635_v59  ;;  %v770_v49 = vsel %vm642_vm6, %v2040_v7, %v762_v28 }
 0x250   :  { %v662_v16 = vand.u32 2147483647, %v2070_v61  ;;  %v2079_v18 = vadd.f32 %v1319_v11, %v2037_v42  ;;  %v620_v19 = vpop.f32.mrb[7].mxu0  ;;  %v761_v25 = vadd.f32 %v705_v21, %v633_v6  ;;  %v638_v3 = vmax.f32 %v2070_v61, 0.0 }
 0x251   :  { %v660_v36 = vand.u32 2147483647, %v2073_v39  ;;  %v2089_v2 = vadd.f32 %v2037_v42, %v620_v19  ;;  %v768_v42 = vsel %vm640_vm0, %v2043_v13, %v760_v54  ;;  %v771_v13 = vsel %vm643_vm7, %v2047_v17, %v763_v43  ;;  %v1434_v43 = vld [vmem:[#allocation11 + $0x30] sm:$0xff]  }
 0x252   :  { %v670_v26 = vsub.f32 0.0, %v662_v16  ;;  %v663_v27 = vand.u32 2147483647, %v2079_v18  ;;  %v769_v37 = vsel %vm641_vm5, %v2051_v20, %v761_v25  ;;  %v777_v34 = vpack.c.bf16 %v771_v13, %v770_v49 }
 0x253   :  { %v668_v32 = vsub.f32 0.0, %v660_v36  ;;  %v661_v33 = vand.u32 2147483647, %v2089_v2  ;;  %v776_v41 = vpack.c.bf16 %v769_v37, %v768_v42  ;;  %v636_v4 = vmax.f32 %v2073_v39, 0.0 }
 0x254   :  { %v684_v29 = vmul.f32 1.442695, %v670_v26  ;;  %v671_v40 = vsub.f32 0.0, %v663_v27  ;;  %v639_v6 = vmax.f32 %v2079_v18, 0.0  ;;  %v637_v23 = vmax.f32 %v2089_v2, 0.0 }
 0x255   :  { %v680_v46 = vmul.f32 1.442695, %v668_v32  ;;  %v669_v47 = vsub.f32 0.0, %v661_v33  ;;  %1336 = vmatprep.mubr.bf16.mxu1 %v776_v41  ;;  %vm646_vm12 = vcmp.ne.f32.partialorder %v2070_v61, %v2070_v61  ;;  %vm647_vm13 = vcmp.ne.f32.partialorder %v2079_v18, %v2079_v18  ;;  %v1429_v41 = vld [vmem:[#allocation11 + $0x8] sm:$0xff]  }
 0x256   :  { %1484 = vpow2.f32 %v684_v29  ;;  %v686_v48 = vmul.f32 1.442695, %v671_v40  ;;  %1337 = vmatmul.mubr.bf16.vlgmr.msra.gmra.mrb[0].mxu1 %v777_v34  ;;  %vm644_vm14 = vcmp.ne.f32.partialorder %v2073_v39, %v2073_v39  ;;  %vm645_vm15 = vcmp.ne.f32.partialorder %v2089_v2, %v2089_v2  ;;  %v1428_v40 = vld [vmem:[#allocation11] sm:$0xff]  }
 0x257   :  { %1486 = vpow2.f32 %v680_v46  ;;  %v682_v20 = vmul.f32 1.442695, %v669_v47  ;;  %1344 = vmatprep.subr.bf16.mxu0 %v1428_v40  ;;  %1368 = vmatprep.subr.bf16.mxu1 %v1428_v40  ;;  %v1435_v46 = vld [vmem:[#allocation11 + $0x38] sm:$0xff]  }
 0x258   :  { %1488 = vpow2.f32 %v686_v48  ;;  %1345 = vmatpush3.bf16.msra.mxu0 %v1428_v40  ;;  %1376 = vmatpush3.bf16.msra.mxu1 %v1428_v40  ;;  %v2124_v47 = vld [vmem:[#allocation10 + $0x1] ss:$0 sm:$0xff] }
 0x259   :  { %1490 = vpow2.f32 %v682_v20  ;;  %1346 = vmatprep.subr.bf16.mxu0 %v1429_v41  ;;  %1369 = vmatprep.subr.bf16.mxu1 %v1429_v41 }
 0x25c   :  { %1347 = vmatpush3.bf16.msra.mxu0 %v1429_v41  ;;  %1377 = vmatpush3.bf16.msra.mxu1 %v1429_v41 }
 0x260   :  { %v1485_v50 = vpop.eup %1484 }
 0x261   :  { %v1487_v38 = vpop.eup %1486  ;;  %v742_v51 = vadd.f32 1.0, %v1485_v50  ;;  %v745_v7 = vmul.f32 -0.5, %v1485_v50  ;;  %v748_v62 = vand.u32 2147483647, %v1485_v50 }
 0x262   :  { %v1489_v52 = vpop.eup %1488  ;;  %v724_v53 = vadd.f32 1.0, %v1487_v38  ;;  %v727_v17 = vmul.f32 -0.5, %v1487_v38  ;;  %v730_v60 = vand.u32 2147483647, %v1487_v38 }
 0x263   :  { %v1491_v30 = vpop.eup %1490  ;;  %1492 = vlog2.f32 %v742_v51  ;;  %v751_v55 = vadd.f32 1.0, %v1489_v52  ;;  %v754_v45 = vmul.f32 -0.5, %v1489_v52  ;;  %v746_v57 = vadd.f32 1.0, %v745_v7 }
 0x264   :  { %1494 = vlog2.f32 %v724_v53  ;;  %v733_v44 = vadd.f32 1.0, %v1491_v30  ;;  %v736_v24 = vmul.f32 -0.5, %v1491_v30  ;;  %v728_v59 = vadd.f32 1.0, %v727_v17 }
 0x265   :  { %1496 = vlog2.f32 %v751_v55  ;;  %v755_v63 = vadd.f32 1.0, %v754_v45  ;;  %v757_v0 = vand.u32 2147483647, %v1489_v52  ;;  %v739_v56 = vand.u32 2147483647, %v1491_v30 }
 0x266   :  { %1498 = vlog2.f32 %v733_v44  ;;  %v737_v5 = vadd.f32 1.0, %v736_v24  ;;  %v747_v8 = vmul.f32 %v1485_v50, %v746_v57  ;;  %v729_v14 = vmul.f32 %v1487_v38, %v728_v59 }
 0x267   :  { %vm731_vm8 = vcmp.lt.f32.partialorder %v730_v60, 0.0004427343  ;;  %vm749_vm9 = vcmp.lt.f32.partialorder %v748_v62, 0.0004427343  ;;  %v756_v12 = vmul.f32 %v1489_v52, %v755_v63  ;;  %vm758_vm10 = vcmp.lt.f32.partialorder %v757_v0, 0.0004427343 }
 0x268   :  { %v738_v19 = vmul.f32 %v1491_v30, %v737_v5  ;;  %vm740_vm11 = vcmp.lt.f32.partialorder %v739_v56, 0.0004427343 }
 0x26d   :  { %v1493_v1 = vpop.eup %1492 }
 0x26e   :  { %v1495_v35 = vpop.eup %1494  ;;  %v744_v31 = vmul.f32 0.6931472, %v1493_v1 }
 0x26f   :  { %v1497_v9 = vpop.eup %1496  ;;  %v726_v10 = vmul.f32 0.6931472, %v1495_v35 }
 0x270   :  { %v1499_v58 = vpop.eup %1498  ;;  %v750_v11 = vsel %vm749_vm9, %v747_v8, %v744_v31  ;;  %v753_v54 = vmul.f32 0.6931472, %v1497_v9 }
 0x271   :  { %v732_v15 = vsel %vm731_vm8, %v729_v14, %v726_v10  ;;  %v735_v16 = vmul.f32 0.6931472, %v1499_v58  ;;  %v766_v21 = vadd.f32 %v750_v11, %v638_v3 }
 0x272   :  { %v764_v36 = vadd.f32 %v732_v15, %v636_v4  ;;  %v759_v25 = vsel %vm758_vm10, %v756_v12, %v753_v54 }
 0x273   :  { %v741_v22 = vsel %vm740_vm11, %v738_v19, %v735_v16  ;;  %v767_v26 = vadd.f32 %v759_v25, %v639_v6  ;;  %v774_v28 = vsel %vm646_vm12, %v2070_v61, %v766_v21  ;;  %v1430_v61 = vld [vmem:[#allocation11 + $0x10] sm:$0xff]  }
 0x274   :  { %v765_v27 = vadd.f32 %v741_v22, %v637_v23  ;;  %v772_v33 = vsel %vm644_vm14, %v2073_v39, %v764_v36  ;;  %1348 = vmatprep.subr.bf16.mxu0 %v1430_v61  ;;  %1370 = vmatprep.subr.bf16.mxu1 %v1430_v61  ;;  %v1431_v39 = vld [vmem:[#allocation11 + $0x18] sm:$0xff]  }
 0x275   :  { %v775_v32 = vsel %vm647_vm13, %v2079_v18, %v767_v26  ;;  %1349 = vmatpush3.bf16.msra.mxu0 %v1430_v61  ;;  %1378 = vmatpush3.bf16.msra.mxu1 %v1430_v61  ;;  %v1432_v18 = vld [vmem:[#allocation11 + $0x20] sm:$0xff]  }
 0x276   :  { %v773_v42 = vsel %vm645_vm15, %v2089_v2, %v765_v27  ;;  %v779_v37 = vpack.c.bf16 %v775_v32, %v774_v28  ;;  %1350 = vmatprep.subr.bf16.mxu0 %v1431_v39  ;;  %1371 = vmatprep.subr.bf16.mxu1 %v1431_v39  ;;  %v1433_v2 = vld [vmem:[#allocation11 + $0x28] sm:$0xff]  }
 0x277   :  { %v778_v29 = vpack.c.bf16 %v773_v42, %v772_v33 }
 0x279   :  { %1340 = vmatprep.mubr.bf16.mxu1 %v778_v29  ;;  %1351 = vmatpush3.bf16.msra.mxu0 %v1431_v39 }
 0x27a   :  { %1341 = vmatmul.mubr.bf16.gmra.mrb[4].mxu1 %v779_v37  ;;  %1352 = vmatprep.subr.bf16.mxu0 %v1432_v18 }
 0x27b   :  { %1379 = vmatpush3.bf16.msra.mxu1 %v1431_v39 }
 0x27c   :  { %1372 = vmatprep.subr.bf16.mxu1 %v1432_v18 }
 0x27d   :  { %1353 = vmatpush3.bf16.msra.mxu0 %v1432_v18 }
 0x27e   :  { %1354 = vmatprep.subr.bf16.mxu0 %v1433_v2 }
 0x27f   :  { %1380 = vmatpush3.bf16.msra.mxu1 %v1432_v18 }
 0x280   :  { %1373 = vmatprep.subr.bf16.mxu1 %v1433_v2 }
 0x281   :  { %1355 = vmatpush3.bf16.msra.mxu0 %v1433_v2 }
 0x282   :  { %1356 = vmatprep.subr.bf16.mxu0 %v1434_v43 }
 0x283   :  { %1381 = vmatpush3.bf16.msra.mxu1 %v1433_v2 }
 0x284   :  { %1374 = vmatprep.subr.bf16.mxu1 %v1434_v43 }
 0x285   :  { %1357 = vmatpush3.bf16.msra.mxu0 %v1434_v43 }
 0x286   :  { %1358 = vmatprep.subr.bf16.mxu0 %v1435_v46 }
 0x287   :  { %1382 = vmatpush3.bf16.msra.mxu1 %v1434_v43 }
 0x288   :  { %1375 = vmatprep.subr.bf16.mxu1 %v1435_v46 }
 0x289   :  { %1359 = vmatpush3.bf16.msra.mxu0 %v1435_v46 }
 0x28b   :  { %1383 = vmatpush3.bf16.msra.mxu1 %v1435_v46 }
 0x329   :  { %v1338_v48 = vpop.f32.mrb[0].mxu1 }
 0x32a   :  { %v2127_v49 = vadd.f32 %v1338_v48, %v2124_v47  ;;  %v884_v13 = vpop.f32.mrb[1].mxu1 }
 0x32b   :  { %v2130_v20 = vadd.f32 %v2124_v47, %v884_v13  ;;  %v1339_v34 = vpop.f32.mrb[2].mxu1 }
 0x32c   :  { %v941_v50 = vand.u32 2147483647, %v2127_v49  ;;  %v2134_v38 = vadd.f32 %v1339_v34, %v2124_v47  ;;  %v887_v51 = vpop.f32.mrb[3].mxu1  ;;  %v917_v14 = vmax.f32 %v2127_v49, 0.0  ;;  %vm925_vm0 = vcmp.ne.f32.partialorder %v2127_v49, %v2127_v49 }
 0x32d   :  { %v939_v52 = vand.u32 2147483647, %v2130_v20  ;;  %v2138_v53 = vadd.f32 %v2124_v47, %v887_v51  ;;  %v915_v54 = vmax.f32 %v2130_v20, 0.0  ;;  %vm923_vm6 = vcmp.ne.f32.partialorder %v2130_v20, %v2130_v20 }
 0x32e   :  { %v949_v30 = vsub.f32 0.0, %v941_v50  ;;  %v942_v55 = vand.u32 2147483647, %v2134_v38  ;;  %v918_v12 = vmax.f32 %v2134_v38, 0.0  ;;  %vm926_vm2 = vcmp.ne.f32.partialorder %v2134_v38, %v2134_v38 }
 0x32f   :  { %v947_v44 = vsub.f32 0.0, %v939_v52  ;;  %v940_v7 = vand.u32 2147483647, %v2138_v53  ;;  %v916_v41 = vmax.f32 %v2138_v53, 0.0  ;;  %vm924_vm7 = vcmp.ne.f32.partialorder %v2138_v53, %v2138_v53 }
 0x330   :  { %v959_v17 = vmul.f32 1.442695, %v949_v30  ;;  %v950_v45 = vsub.f32 0.0, %v942_v55 }
 0x331   :  { %v955_v24 = vmul.f32 1.442695, %v947_v44  ;;  %v948_v57 = vsub.f32 0.0, %v940_v7 }
 0x332   :  { %1500 = vpow2.f32 %v959_v17  ;;  %v961_v59 = vmul.f32 1.442695, %v950_v45 }
 0x333   :  { %1502 = vpow2.f32 %v955_v24  ;;  %v957_v60 = vmul.f32 1.442695, %v948_v57 }
 0x334   :  { %1504 = vpow2.f32 %v961_v59 }
 0x335   :  { %1506 = vpow2.f32 %v957_v60 }
 0x33c   :  { %v1501_v62 = vpop.eup %1500 }
 0x33d   :  { %v1503_v63 = vpop.eup %1502  ;;  %v989_v0 = vadd.f32 1.0, %v1501_v62  ;;  %v992_v35 = vmul.f32 -0.5, %v1501_v62  ;;  %v995_v8 = vand.u32 2147483647, %v1501_v62 }
 0x33e   :  { %v1505_v1 = vpop.eup %1504  ;;  %v971_v3 = vadd.f32 1.0, %v1503_v63  ;;  %v974_v9 = vmul.f32 -0.5, %v1503_v63  ;;  %v977_v10 = vand.u32 2147483647, %v1503_v63 }
 0x33f   :  { %v2142_v4 = vpop.eup %1506  ;;  %1508 = vlog2.f32 %v989_v0  ;;  %v998_v5 = vadd.f32 1.0, %v1505_v1  ;;  %v1001_v56 = vmul.f32 -0.5, %v1505_v1  ;;  %v993_v31 = vadd.f32 1.0, %v992_v35 }
 0x340   :  { %1510 = vlog2.f32 %v971_v3  ;;  %v980_v6 = vadd.f32 1.0, %v2142_v4  ;;  %v1004_v15 = vand.u32 2147483647, %v1505_v1  ;;  %vm996_vm1 = vcmp.lt.f32.partialorder %v995_v8, 0.0004427343 }
 0x341   :  { %1512 = vlog2.f32 %v998_v5  ;;  %v1002_v58 = vadd.f32 1.0, %v1001_v56  ;;  %v994_v21 = vmul.f32 %v1501_v62, %v993_v31  ;;  %v975_v26 = vadd.f32 1.0, %v974_v9 }
 0x342   :  { %1514 = vlog2.f32 %v980_v6  ;;  %vm2155_vm3 = vcmp.lt.f32.partialorder %v977_v10, 0.0004427343  ;;  %v983_v28 = vmul.f32 -0.5, %v2142_v4  ;;  %vm1005_vm4 = vcmp.lt.f32.partialorder %v1004_v15, 0.0004427343 }
 0x343   :  { %v1003_v42 = vmul.f32 %v1505_v1, %v1002_v58  ;;  %v976_v55 = vmul.f32 %v1503_v63, %v975_v26  ;;  %v986_v44 = vand.u32 2147483647, %v2142_v4 }
 0x344   :  { %v984_v50 = vadd.f32 1.0, %v983_v28 }
 0x345   :  { %vm987_vm5 = vcmp.lt.f32.partialorder %v986_v44, 0.0004427343 }
 0x346   :  { %v985_v0 = vmul.f32 %v2142_v4, %v984_v50 }
 0x349   :  { %v1509_v11 = vpop.eup %1508 }
 0x34a   :  { %v1511_v16 = vpop.eup %1510  ;;  %v991_v19 = vmul.f32 0.6931472, %v1509_v11 }
 0x34b   :  { %v1513_v36 = vpop.eup %1512  ;;  %v973_v46 = vmul.f32 0.6931472, %v1511_v16 }
 0x34c   :  { %v997_v32 = vsel %vm996_vm1, %v994_v21, %v991_v19  ;;  %v1000_v33 = vmul.f32 0.6931472, %v1513_v36  ;;  %v1515_v51 = vpop.eup %1514 }
 0x34d   :  { %v1342_v23 = vpop.f32.mrb[4].mxu1  ;;  %v1045_v40 = vadd.f32 %v997_v32, %v917_v14  ;;  %v979_v60 = vsel %vm2155_vm3, %v976_v55, %v973_v46  ;;  %v982_v63 = vmul.f32 0.6931472, %v1515_v51 }
 0x34e   :  { %v2153_v25 = vadd.f32 %v1342_v23, %v2124_v47  ;;  %v900_v22 = vpop.f32.mrb[5].mxu1  ;;  %v1006_v18 = vsel %vm1005_vm4, %v1003_v42, %v1000_v33  ;;  %v1043_v1 = vadd.f32 %v979_v60, %v915_v54 }
 0x34f   :  { %v2161_v37 = vadd.f32 %v2124_v47, %v900_v22  ;;  %v1343_v29 = vpop.f32.mrb[6].mxu1  ;;  %v1046_v48 = vadd.f32 %v1006_v18, %v918_v12  ;;  %v1053_v7 = vsel %vm925_vm0, %v2127_v49, %v1045_v40  ;;  %vm1199_vm0 = vcmask 23552  }
 0x350   :  { %v945_v61 = vand.u32 2147483647, %v2153_v25  ;;  %v903_v39 = vpop.f32.mrb[7].mxu1  ;;  %v2167_v43 = vadd.f32 %v1343_v29, %v2124_v47  ;;  %v1051_v35 = vsel %vm923_vm6, %v2130_v20, %v1043_v1  ;;  %vm929_vm12 = vcmp.ne.f32.partialorder %v2153_v25, %v2153_v25 }
 0x351   :  { %v943_v2 = vand.u32 2147483647, %v2161_v37  ;;  %v2170_v34 = vadd.f32 %v2124_v47, %v903_v39  ;;  %v1054_v17 = vsel %vm926_vm2, %v2134_v38, %v1046_v48  ;;  %v988_v38 = vsel %vm987_vm5, %v985_v0, %v982_v63  ;;  %v1251_v63 = vld [vmem:[#allocation13] ss:$0 sm:$0xff] }
 0x352   :  { %v953_v13 = vsub.f32 0.0, %v945_v61  ;;  %v946_v30 = vand.u32 2147483647, %v2167_v43  ;;  %v1060_v24 = vpack.c.bf16 %v1054_v17, %v1053_v7  ;;  %v1044_v5 = vadd.f32 %v988_v38, %v916_v41 }
 0x353   :  { %v951_v52 = vsub.f32 0.0, %v943_v2  ;;  %v944_v45 = vand.u32 2147483647, %v2170_v34  ;;  %v921_v41 = vmax.f32 %v2153_v25, 0.0  ;;  %v919_v39 = vmax.f32 %v2161_v37, 0.0 }
 0x354   :  { %v967_v47 = vmul.f32 1.442695, %v953_v13  ;;  %v954_v59 = vsub.f32 0.0, %v946_v30  ;;  %v1052_v6 = vsel %vm924_vm7, %v2138_v53, %v1044_v5  ;;  %v922_v2 = vmax.f32 %v2167_v43, 0.0 }
 0x355   :  { %v963_v57 = vmul.f32 1.442695, %v951_v52  ;;  %v952_v62 = vsub.f32 0.0, %v944_v45  ;;  %v1059_v4 = vpack.c.bf16 %v1052_v6, %v1051_v35  ;;  %v920_v55 = vmax.f32 %v2170_v34, 0.0 }
 0x356   :  { %1516 = vpow2.f32 %v967_v47  ;;  %v969_v49 = vmul.f32 1.442695, %v954_v59  ;;  %vm930_vm13 = vcmp.ne.f32.partialorder %v2167_v43, %v2167_v43  ;;  %vm927_vm14 = vcmp.ne.f32.partialorder %v2161_v37, %v2161_v37 }
 0x357   :  { %1518 = vpow2.f32 %v963_v57  ;;  %v965_v3 = vmul.f32 1.442695, %v952_v62  ;;  %1360 = vmatprep.mubr.bf16.mxu0 %v1059_v4  ;;  %vm928_vm15 = vcmp.ne.f32.partialorder %v2170_v34, %v2170_v34 }
 0x358   :  { %1520 = vpow2.f32 %v969_v49  ;;  %1361 = vmatmul.mubr.bf16.vlgmr.msra.gmra.mrb[8].mxu0 %v1060_v24 }
 0x359   :  { %1522 = vpow2.f32 %v965_v3 }
 0x360   :  { %v1517_v56 = vpop.eup %1516 }
 0x361   :  { %v1519_v31 = vpop.eup %1518  ;;  %v1025_v8 = vadd.f32 1.0, %v1517_v56  ;;  %v1028_v54 = vmul.f32 -0.5, %v1517_v56  ;;  %v1031_v16 = vand.u32 2147483647, %v1517_v56 }
 0x362   :  { %v1007_v9 = vadd.f32 1.0, %v1519_v31  ;;  %v1521_v10 = vpop.eup %1520  ;;  %v1010_v12 = vmul.f32 -0.5, %v1519_v31  ;;  %v1013_v21 = vand.u32 2147483647, %v1519_v31 }
 0x363   :  { %1524 = vlog2.f32 %v1025_v8  ;;  %v1523_v14 = vpop.eup %1522  ;;  %v1034_v58 = vadd.f32 1.0, %v1521_v10  ;;  %v1037_v20 = vmul.f32 -0.5, %v1521_v10  ;;  %v1029_v15 = vadd.f32 1.0, %v1028_v54 }
 0x364   :  { %1526 = vlog2.f32 %v1007_v9  ;;  %v1016_v11 = vadd.f32 1.0, %v1523_v14  ;;  %v1019_v53 = vmul.f32 -0.5, %v1523_v14  ;;  %v1011_v19 = vadd.f32 1.0, %v1010_v12 }
 0x365   :  { %1528 = vlog2.f32 %v1034_v58  ;;  %v1038_v36 = vadd.f32 1.0, %v1037_v20  ;;  %v1030_v27 = vmul.f32 %v1517_v56, %v1029_v15  ;;  %v1040_v28 = vand.u32 2147483647, %v1521_v10 }
 0x366   :  { %1530 = vlog2.f32 %v1016_v11  ;;  %v1020_v32 = vadd.f32 1.0, %v1019_v53  ;;  %vm1032_vm8 = vcmp.lt.f32.partialorder %v1031_v16, 0.0004427343  ;;  %v1012_v42 = vmul.f32 %v1519_v31, %v1011_v19 }
 0x367   :  { %v1022_v29 = vand.u32 2147483647, %v1523_v14  ;;  %vm1014_vm9 = vcmp.lt.f32.partialorder %v1013_v21, 0.0004427343  ;;  %v1039_v48 = vmul.f32 %v1521_v10, %v1038_v36  ;;  %vm1041_vm10 = vcmp.lt.f32.partialorder %v1040_v28, 0.0004427343 }
 0x368   :  { %v1021_v52 = vmul.f32 %v1523_v14, %v1020_v32 }
 0x369   :  { %vm1023_vm11 = vcmp.lt.f32.partialorder %v1022_v29, 0.0004427343 }
 0x36d   :  { %v1525_v23 = vpop.eup %1524 }
 0x36e   :  { %v1527_v22 = vpop.eup %1526  ;;  %v1027_v26 = vmul.f32 0.6931472, %v1525_v23 }
 0x36f   :  { %v1009_v33 = vmul.f32 0.6931472, %v1527_v22  ;;  %v1529_v40 = vpop.eup %1528 }
 0x370   :  { %v1033_v61 = vsel %vm1032_vm8, %v1030_v27, %v1027_v26  ;;  %v1531_v18 = vpop.eup %1530  ;;  %v1036_v46 = vmul.f32 0.6931472, %v1529_v40 }
 0x371   :  { %v1015_v13 = vsel %vm1014_vm9, %v1012_v42, %v1009_v33  ;;  %v1049_v50 = vadd.f32 %v1033_v61, %v921_v41  ;;  %v1018_v51 = vmul.f32 0.6931472, %v1531_v18 }
 0x372   :  { %v1042_v30 = vsel %vm1041_vm10, %v1039_v48, %v1036_v46  ;;  %v1047_v44 = vadd.f32 %v1015_v13, %v919_v39 }
 0x373   :  { %v1050_v7 = vadd.f32 %v1042_v30, %v922_v2  ;;  %v1024_v17 = vsel %vm1023_vm11, %v1021_v52, %v1018_v51  ;;  %v1057_v45 = vsel %vm929_vm12, %v2153_v25, %v1049_v50 }
 0x374   :  { %v1048_v47 = vadd.f32 %v1024_v17, %v920_v55  ;;  %v1055_v59 = vsel %vm927_vm14, %v2161_v37, %v1047_v44 }
 0x375   :  { %v1058_v24 = vsel %vm930_vm13, %v2167_v43, %v1050_v7 }
 0x376   :  { %v1062_v57 = vpack.c.bf16 %v1058_v24, %v1057_v45  ;;  %v1056_v60 = vsel %vm928_vm15, %v2170_v34, %v1048_v47 }
 0x377   :  { %v1061_v62 = vpack.c.bf16 %v1056_v60, %v1055_v59 }
 0x379   :  { %1364 = vmatprep.mubr.bf16.mxu1 %v1061_v62 }
 0x37a   :  { %1365 = vmatmul.mubr.bf16.vlgmr.msra.gmra.mrb[8].mxu1 %v1062_v57 }
 0x42b   :  { %v1362_v0 = vpop.f32.mrb[8].mxu0 }
 0x42c   :  { %v1177_v25 = vadd.f32 %v1362_v0, %v1251_v63  ;;  %v1168_v49 = vpop.f32.mrb[9].mxu0 }
 0x42d   :  { %v1169_v43 = vadd.f32 %v1251_v63, %v1168_v49  ;;  %v1363_v1 = vpop.f32.mrb[10].mxu0 }
 0x42e   :  { %1202 = vst.msk [vmem:[#allocation14 + $0x10] sm:$0xff] %vm1199_vm0, %v1177_v25  ;;  %v1180_v3 = vadd.f32 %v1363_v1, %v1251_v63  ;;  %v1171_v38 = vpop.f32.mrb[11].mxu0 }
 0x42f   :  { %1200 = vst.msk [vmem:[#allocation14] sm:$0xff] %vm1199_vm0, %v1169_v43  ;;  %v1172_v5 = vadd.f32 %v1251_v63, %v1171_v38 }
 0x430   :  { %1203 = vst.msk [vmem:[#allocation14 + $0x18] sm:$0xff] %vm1199_vm0, %v1180_v3 }
 0x431   :  { %1201 = vst.msk [vmem:[#allocation14 + $0x8] sm:$0xff] %vm1199_vm0, %v1172_v5 }
 0x44d   :  { %v1366_v37 = vpop.f32.mrb[8].mxu1 }
 0x44e   :  { %v1193_v34 = vadd.f32 %v1366_v37, %v1251_v63  ;;  %v1184_v35 = vpop.f32.mrb[9].mxu1 }
 0x44f   :  { %v1185_v6 = vadd.f32 %v1251_v63, %v1184_v35  ;;  %v1367_v4 = vpop.f32.mrb[10].mxu1 }
 0x450   :  { %1206 = vst.msk [vmem:[#allocation14 + $0x30] sm:$0xff] %vm1199_vm0, %v1193_v34  ;;  %v1196_v56 = vadd.f32 %v1367_v4, %v1251_v63  ;;  %v1187_v31 = vpop.f32.mrb[11].mxu1 }
 0x451   :  { %1204 = vst.msk [vmem:[#allocation14 + $0x20] sm:$0xff] %vm1199_vm0, %v1185_v6  ;;  %v1188_v8 = vadd.f32 %v1251_v63, %v1187_v31 }
 0x452   :  { %1207 = vst.msk [vmem:[#allocation14 + $0x38] sm:$0xff] %vm1199_vm0, %v1196_v56 }
 0x453   :  { %1205 = vst.msk [vmem:[#allocation14 + $0x28] sm:$0xff] %vm1199_vm0, %v1188_v8 }
 0x454   :  { %1697 = shalt.err (!%p1694_p4)
}
 0x455   :  { %s1698_s16 = scalar_lea.hbm %s2238_s7, 1024 }
 0x456   :  { %p1699_p5 = scmp.ne.s32.totalorder %s2238_s7, %s1698_s16  ;;  %p1702_p6 = scmp.lt.u32.totalorder %s1698_s16, %s2238_s7 }
 0x458   :  { %p1704_p7 = pnand %p1702_p6, %p1699_p5 }
 0x45a   :  { %1707 = shalt.err (!%p1704_p7)
}
 0x45b   :  { %1219 = dma.vmem_to_hbm [thread:$0]  %s1214_s0, 1024, %s2238_s7, [#allocation4], %s1724_s5, %s1724_s5, %s1725_s1  }
 0x45c   :  { %1716 = dma.done.wait [#allocation4], 1024  }
 0x45d   :  { %1717 = vsyncadd [#allocation4], 4294966272 }
 0x45e   :  { %1223 = vsyncpa [#allocation3], 1 }
 0x45f   :  { %1224 = vsyncpa [#allocation6], 1 }
 0x460   :  { %1225 = vsyncpa [#allocation9], 1 }
 0x461   :  { %1226 = vsyncpa [#allocation12], 1 }
 0x462   :  { %1227 = vsyncpa [#allocation4], 1 }

</bundles_post_ra>
